<compile_context>
chip_gen: v6e
topology: v6e:2x2x1
jax: 0.10.0
libtpu: 0.0.40
codegen_flags: <defaults>
</compile_context>

<pallas_src>
import math

import jax
import jax.numpy as jnp
from jax.experimental import pallas as pl
from jax.experimental.pallas import tpu as pltpu

_LANE_W = 1024                               # lane-dense slab width (multiple of 128)
_TARGET_BLOCK_BYTES = 4 * 1024 * 1024        # v5e / v6e block size
_TARGET_BLOCK_BYTES_V7X = 8 * 1024 * 1024    # v7x: halve step count (HBM 2-4x faster)
_VMEM_LIMIT = 32 * 1024 * 1024
_VMEM_LIMIT_V7X = 48 * 1024 * 1024
_FAST_PATH_BYTES = 1 * 1024 * 1024           # below this, plain jnp.maximum wins


def _relu_kernel(x_ref, o_ref):
    # Pure elementwise hot path on the full VMEM tile (VPU max, no cross-lane ops).
    x = x_ref[...]
    o_ref[...] = jnp.maximum(x, jnp.zeros((), x.dtype))


def _tpu_generation():
    """Best-effort TPU generation detection (7 for v7x, 6 for v6e, ...)."""
    try:
        kind = jax.devices()[0].device_kind.lower()
    except Exception:
        return 0
    for g in (7, 6, 5, 4):
        if "v%d" % g in kind:
            return g
    return 0


def _run_pallas_relu(x2d, blk_rows, lane_w, dimension_semantics, vmem_limit_bytes):
    rows = x2d.shape[0]
    grid = (pl.cdiv(rows, blk_rows),)  # partial last block masked by Pallas
    return pl.pallas_call(
        _relu_kernel,
        out_shape=jax.ShapeDtypeStruct(x2d.shape, x2d.dtype),
        grid_spec=pltpu.PrefetchScalarGridSpec(
            num_scalar_prefetch=0,
            grid=grid,
            in_specs=[pl.BlockSpec((blk_rows, lane_w), lambda i: (i, 0))],
            out_specs=pl.BlockSpec((blk_rows, lane_w), lambda i: (i, 0)),
        ),
        compiler_params=pltpu.CompilerParams(
            dimension_semantics=dimension_semantics,
            vmem_limit_bytes=vmem_limit_bytes,
        ),
    )(x2d)


def relu_pallas(x, *, lane_w=_LANE_W):
    """ReLU over an arbitrary-shaped array (NCHW or anything else), dtype-preserving."""
    orig_shape = x.shape
    orig_dtype = x.dtype
    n = x.size
    itemsize = jnp.dtype(orig_dtype).itemsize

    # Small-input fast path: launch overhead dominates, XLA's fused op is as fast.
    if n * itemsize < _FAST_PATH_BYTES or n < lane_w:
        return jnp.maximum(x, jnp.zeros((), orig_dtype))

    gen = _tpu_generation()
    target_bytes = _TARGET_BLOCK_BYTES_V7X if gen >= 7 else _TARGET_BLOCK_BYTES
    vmem_limit = _VMEM_LIMIT_V7X if gen >= 7 else _VMEM_LIMIT

    # Flatten; process only the lane-aligned prefix through the kernel.  The
    # (< lane_w)-element tail is handled by a trivial elementwise op — no
    # full-array pad and no full-array slice on the output.
    flat = jnp.ravel(x)
    rows = n // lane_w
    n_main = rows * lane_w
    has_tail = n_main != n

    # dtype-invariant ~target_bytes blocks: 1024 rows f32, 2048 bf16, 4096 int8.
    # min(...) is either a multiple of 8 or the full row extent -> legal BlockSpec.
    blk_rows = max(8, target_bytes // (lane_w * itemsize))
    blk_rows = min(blk_rows, rows)

    x2d = (flat[:n_main] if has_tail else flat).reshape(rows, lane_w)

    if gen >= 7:
        # Shard the row axis across both v7x TensorCores; fall back if the
        # core-parallel lowering is unavailable on this toolchain.
        try:
            out2d = _run_pallas_relu(
                x2d, blk_rows, lane_w, (pltpu.CORE_PARALLEL,), vmem_limit)
        except Exception:
            out2d = _run_pallas_relu(x2d, blk_rows, lane_w, ("parallel",), vmem_limit)
    else:
        out2d = _run_pallas_relu(x2d, blk_rows, lane_w, ("parallel",), vmem_limit)

    out_main = out2d.reshape(-1)
    if not has_tail:
        return out_main.reshape(orig_shape)
    tail_out = jnp.maximum(flat[n_main:], jnp.zeros((), orig_dtype))
    return jnp.concatenate([out_main, tail_out]).reshape(orig_shape)


def relu_gain():
    """Equivalent of ReLU.calc_gain(): nn.init.calculate_gain('relu') == sqrt(2)."""
    return math.sqrt(2.0)


if __name__ == "__main__":
    key = jax.random.PRNGKey(0)
    k1, k2, k3, k4 = jax.random.split(key, 4)

    # Case 1: tiny NCHW activation consistent with the module's typical use
    # (batch=2, channels=4, spatial=16) -> small-input fast path.
    x1 = jax.random.normal(k1, (2, 4, 16, 16), dtype=jnp.float32)
    y1 = relu_pallas(x1)
    jax.block_until_ready(y1)
    assert y1.shape == x1.shape and y1.dtype == x1.dtype
    assert jnp.array_equal(y1, jnp.maximum(x1, 0.0))

    # Case 2: modest conv activation (2 MiB, lane-aligned) -> Pallas aligned path.
    x2 = jax.random.normal(k2, (2, 64, 64, 64), dtype=jnp.float32)
    y2 = relu_pallas(x2)
    jax.block_until_ready(y2)
    assert y2.shape == x2.shape and y2.dtype == x2.dtype
    assert jnp.array_equal(y2, jnp.maximum(x2, 0.0))

    # Case 3: odd-sized input (n % 1024 != 0) -> Pallas prefix + tiny tail op,
    # no full-array pad/slice.
    x3 = jax.random.normal(k3, (2, 33, 64, 65), dtype=jnp.float32)
    y3 = relu_pallas(x3)
    jax.block_until_ready(y3)
    assert y3.shape == x3.shape and y3.dtype == x3.dtype
    assert jnp.array_equal(y3, jnp.maximum(x3, 0.0))

    # Case 4: bf16 input -> dtype-invariant block bytes (2048-row blocks).
    x4 = jax.random.normal(k4, (4, 64, 64, 64), dtype=jnp.bfloat16)
    y4 = relu_pallas(x4)
    jax.block_until_ready(y4)
    assert y4.shape == x4.shape and y4.dtype == x4.dtype
    assert jnp.array_equal(y4, jnp.maximum(x4, jnp.bfloat16(0)))

    print("KERNEL_OK")
</pallas_src>

<mosaic_0001>
module attributes {stable_mosaic.version = 11 : i64} {
  func.func @_relu_kernel(%arg0: i32, %arg1: memref<512x1024xf32, #tpu.memory_space<vmem>>, %arg2: memref<512x1024xf32, #tpu.memory_space<vmem>>) attributes {dimension_semantics = [#tpu.dimension_semantics<parallel>], iteration_bounds = array<i64: 1>, scalar_prefetch = 0 : i64, scratch_operands = 0 : i64, tpu.core_type = #tpu.core_type<tc>, window_params = [{transform_indices = @transform_0, window_bounds = array<i64: 512, 1024>}, {transform_indices = @transform_1, window_bounds = array<i64: 512, 1024>}]} {
    %c0 = arith.constant 0 : index
    %c0_0 = arith.constant 0 : index
    %0 = vector.load %arg1[%c0, %c0_0] : memref<512x1024xf32, #tpu.memory_space<vmem>>, vector<512x1024xf32>
    %cst = arith.constant 0.000000e+00 : f32
    %1 = vector.broadcast %cst : f32 to vector<512x1024xf32>
    %2 = arith.maximumf %0, %1 : vector<512x1024xf32>
    %c0_1 = arith.constant 0 : index
    %c0_2 = arith.constant 0 : index
    %3 = vector.load %arg2[%c0_1, %c0_2] : memref<512x1024xf32, #tpu.memory_space<vmem>>, vector<512x1024xf32>
    tpu.vector_store %arg2[%c0_1, %c0_2], %2 {strides = array<i32>} : memref<512x1024xf32, #tpu.memory_space<vmem>>, vector<512x1024xf32>,
    return
  }
  func.func @transform_0(%arg0: i32) -> (i32, i32) {
    %c0_i32 = arith.constant 0 : i32
    %c0_i32_0 = arith.constant 0 : i32
    return %arg0, %c0_i32 : i32, i32
  }
  func.func @transform_1(%arg0: i32) -> (i32, i32) {
    %c0_i32 = arith.constant 0 : i32
    %c0_i32_0 = arith.constant 0 : i32
    return %arg0, %c0_i32 : i32, i32
  }
}

</mosaic_0001>

<bundles_post_ra>
// kernel: tpu_custom_call.1
= control target key start
LH: loop header
LB: loop body
LE: loop exit
PB: predicated region body
PF: predicated region fallthrough
CT: control target
= control target key end

     0   :  { %6 = vsyncpa [#allocation3], 0  ;;  %s1650_s0 = inlined_call_operand.hbm [shape: f32[512,1024], index: 0, kind: input, shape index: {}]   ;;  %s1651_s1 = inlined_call_operand.hbm [shape: f32[512,1024], index: 1, kind: output, shape index: {}]  }
   0x1   :  { %7 = vsyncpa [#allocation4], 0  ;;  %s1624_s6 = smov [#allocation2]  }
   0x2   :  { %s13_s7 = sshll.u32 %s1624_s6, 4  ;;  %s14_s7 = int_to_ptr.vmem [resolvable:$true] %s13_s7 }
   0x3   :  { %s1588_s8 = scalar_lea.vmem %s14_s7, 65536  ;;  %p1593_p1 = scmp.lt.s32.totalorder %s14_s7, %s14_s7 }
   0x4   :  { %p1589_p0 = scmp.ne.s32.totalorder %s14_s7, %s1588_s8  ;;  %p1594_p2 = scmp.lt.s32.totalorder %s1588_s8, %s1588_s8 }
   0x6   :  { %p1595_p3 = por %p1594_p2, %p1593_p1 }
   0x8   :  { %p1596_p4 = pnand %p1595_p3, %p1589_p0 }
   0xa   :  { %1599 = shalt.err (!%p1596_p4)
}
   0xb   :  { %s1625_s9 = smov 1024   ;;  %s1626_s10 = smov 64  }
   0xc   :  { %19 = dma.hbm_to_vmem [thread:$0]  %s1650_s0, 65536, %s14_s7, [#allocation3], %s1625_s9, %s1625_s9, %s1626_s10  }
   0xd   :  { %1620 = dma.done.wait [#allocation3], 65536  }
   0xe   :  { %1621 = vsyncadd [#allocation3], 4294901760  ;;  %v23_v0 = vld [vmem:[#allocation2] sm:$0xff]  ;;  %v24_v1 = vld [vmem:[#allocation2 + $0x8] sm:$0xff]  ;;  %s1627_s0 = smov [#allocation5]  }
   0xf   :  { %v25_v2 = vld [vmem:[#allocation2 + $0x10] sm:$0xff]  ;;  %v535_v3 = vmax.f32 %v23_v0, 0.0  ;;  %v536_v4 = vmax.f32 %v24_v1, 0.0  ;;  %v26_v6 = vld [vmem:[#allocation2 + $0x18] sm:$0xff]  ;;  %v27_v7 = vld [vmem:[#allocation2 + $0x20] sm:$0xff]  ;;  %s1564_s13 = sshll.u32 %s1627_s0, 4  ;;  %s1565_s13 = int_to_ptr.vmem [resolvable:$true] %s1564_s13 }
  0x10   :  { %v537_v5 = vmax.f32 %v25_v2, 0.0  ;;  %v28_v8 = vld [vmem:[#allocation2 + $0x28] sm:$0xff]  ;;  %v538_v9 = vmax.f32 %v26_v6, 0.0  ;;  %v539_v10 = vmax.f32 %v27_v7, 0.0  ;;  %v29_v12 = vld [vmem:[#allocation2 + $0x30] sm:$0xff]  ;;  %v30_v13 = vld [vmem:[#allocation2 + $0x38] sm:$0xff]  ;;  %p1605_p6 = scmp.lt.s32.totalorder %s1565_s13, %s1565_s13 }
  0x11   :  { %v540_v11 = vmax.f32 %v28_v8, 0.0  ;;  %v31_v14 = vld [vmem:[#allocation2 + $0x40] sm:$0xff]  ;;  %1047 = vst [vmem:[#allocation5] sm:$0xff] %v535_v3  ;;  %1048 = vst [vmem:[#allocation5 + $0x8] sm:$0xff] %v536_v4  ;;  %v541_v15 = vmax.f32 %v29_v12, 0.0  ;;  %v542_v16 = vmax.f32 %v30_v13, 0.0 }
  0x12   :  { %1049 = vst [vmem:[#allocation5 + $0x10] sm:$0xff] %v537_v5  ;;  %v543_v17 = vmax.f32 %v31_v14, 0.0  ;;  %v32_v18 = vld [vmem:[#allocation2 + $0x48] sm:$0xff]  ;;  %v33_v19 = vld [vmem:[#allocation2 + $0x50] sm:$0xff]  ;;  %v34_v20 = vld [vmem:[#allocation2 + $0x58] sm:$0xff]  ;;  %s1600_s14 = scalar_lea.vmem %s1565_s13, 65536 }
  0x13   :  { %1050 = vst [vmem:[#allocation5 + $0x18] sm:$0xff] %v538_v9  ;;  %1051 = vst [vmem:[#allocation5 + $0x20] sm:$0xff] %v539_v10  ;;  %v544_v21 = vmax.f32 %v32_v18, 0.0  ;;  %v545_v22 = vmax.f32 %v33_v19, 0.0  ;;  %v546_v23 = vmax.f32 %v34_v20, 0.0  ;;  %v35_v24 = vld [vmem:[#allocation2 + $0x60] sm:$0xff]  ;;  %p1601_p5 = scmp.ne.s32.totalorder %s1565_s13, %s1600_s14  ;;  %p1606_p7 = scmp.lt.s32.totalorder %s1600_s14, %s1600_s14 }
  0x14   :  { %1052 = vst [vmem:[#allocation5 + $0x28] sm:$0xff] %v540_v11  ;;  %v36_v25 = vld [vmem:[#allocation2 + $0x68] sm:$0xff]  ;;  %v37_v26 = vld [vmem:[#allocation2 + $0x70] sm:$0xff]  ;;  %1053 = vst [vmem:[#allocation5 + $0x30] sm:$0xff] %v541_v15  ;;  %v547_v27 = vmax.f32 %v35_v24, 0.0 }
  0x15   :  { %1054 = vst [vmem:[#allocation5 + $0x38] sm:$0xff] %v542_v16  ;;  %1055 = vst [vmem:[#allocation5 + $0x40] sm:$0xff] %v543_v17  ;;  %v548_v28 = vmax.f32 %v36_v25, 0.0  ;;  %v549_v29 = vmax.f32 %v37_v26, 0.0  ;;  %v38_v30 = vld [vmem:[#allocation2 + $0x78] sm:$0xff]  ;;  %v39_v31 = vld [vmem:[#allocation2 + $0x80] sm:$0xff]  ;;  %p1607_p8 = por %p1606_p7, %p1605_p6 }
  0x16   :  { %v40_v32 = vld [vmem:[#allocation2 + $0x88] sm:$0xff]  ;;  %1056 = vst [vmem:[#allocation5 + $0x48] sm:$0xff] %v544_v21  ;;  %1057 = vst [vmem:[#allocation5 + $0x50] sm:$0xff] %v545_v22  ;;  %v550_v33 = vmax.f32 %v38_v30, 0.0  ;;  %v551_v34 = vmax.f32 %v39_v31, 0.0  ;;  %v41_v36 = vld [vmem:[#allocation2 + $0x90] sm:$0xff] }
  0x17   :  { %1058 = vst [vmem:[#allocation5 + $0x58] sm:$0xff] %v546_v23  ;;  %v552_v35 = vmax.f32 %v40_v32, 0.0  ;;  %v42_v37 = vld [vmem:[#allocation2 + $0x98] sm:$0xff]  ;;  %v43_v38 = vld [vmem:[#allocation2 + $0xa0] sm:$0xff]  ;;  %1059 = vst [vmem:[#allocation5 + $0x60] sm:$0xff] %v547_v27  ;;  %v553_v39 = vmax.f32 %v41_v36, 0.0  ;;  %p1608_p9 = pnand %p1607_p8, %p1601_p5 }
  0x18   :  { %1060 = vst [vmem:[#allocation5 + $0x68] sm:$0xff] %v548_v28  ;;  %1061 = vst [vmem:[#allocation5 + $0x70] sm:$0xff] %v549_v29  ;;  %v554_v40 = vmax.f32 %v42_v37, 0.0  ;;  %v555_v41 = vmax.f32 %v43_v38, 0.0  ;;  %v44_v42 = vld [vmem:[#allocation2 + $0xa8] sm:$0xff]  ;;  %v45_v43 = vld [vmem:[#allocation2 + $0xb0] sm:$0xff] }
  0x19   :  { %v46_v44 = vld [vmem:[#allocation2 + $0xb8] sm:$0xff]  ;;  %1062 = vst [vmem:[#allocation5 + $0x78] sm:$0xff] %v550_v33  ;;  %1063 = vst [vmem:[#allocation5 + $0x80] sm:$0xff] %v551_v34  ;;  %v556_v45 = vmax.f32 %v44_v42, 0.0  ;;  %v557_v46 = vmax.f32 %v45_v43, 0.0  ;;  %v47_v48 = vld [vmem:[#allocation2 + $0xc0] sm:$0xff] }
  0x1a   :  { %1064 = vst [vmem:[#allocation5 + $0x88] sm:$0xff] %v552_v35  ;;  %v558_v47 = vmax.f32 %v46_v44, 0.0  ;;  %v48_v49 = vld [vmem:[#allocation2 + $0xc8] sm:$0xff]  ;;  %v49_v50 = vld [vmem:[#allocation2 + $0xd0] sm:$0xff]  ;;  %1065 = vst [vmem:[#allocation5 + $0x90] sm:$0xff] %v553_v39  ;;  %v559_v51 = vmax.f32 %v47_v48, 0.0 }
  0x1b   :  { %1066 = vst [vmem:[#allocation5 + $0x98] sm:$0xff] %v554_v40  ;;  %1067 = vst [vmem:[#allocation5 + $0xa0] sm:$0xff] %v555_v41  ;;  %v560_v52 = vmax.f32 %v48_v49, 0.0  ;;  %v561_v53 = vmax.f32 %v49_v50, 0.0  ;;  %v50_v54 = vld [vmem:[#allocation2 + $0xd8] sm:$0xff]  ;;  %v51_v55 = vld [vmem:[#allocation2 + $0xe0] sm:$0xff] }
  0x1c   :  { %v52_v56 = vld [vmem:[#allocation2 + $0xe8] sm:$0xff]  ;;  %1068 = vst [vmem:[#allocation5 + $0xa8] sm:$0xff] %v556_v45  ;;  %1069 = vst [vmem:[#allocation5 + $0xb0] sm:$0xff] %v557_v46  ;;  %v562_v57 = vmax.f32 %v50_v54, 0.0  ;;  %v563_v58 = vmax.f32 %v51_v55, 0.0  ;;  %v53_v60 = vld [vmem:[#allocation2 + $0xf0] sm:$0xff] }
  0x1d   :  { %1070 = vst [vmem:[#allocation5 + $0xb8] sm:$0xff] %v558_v47  ;;  %v564_v59 = vmax.f32 %v52_v56, 0.0  ;;  %v54_v61 = vld [vmem:[#allocation2 + $0xf8] sm:$0xff]  ;;  %v55_v62 = vld [vmem:[#allocation2 + $0x100] sm:$0xff]  ;;  %1071 = vst [vmem:[#allocation5 + $0xc0] sm:$0xff] %v559_v51  ;;  %v565_v63 = vmax.f32 %v53_v60, 0.0 }
  0x1e   :  { %1072 = vst [vmem:[#allocation5 + $0xc8] sm:$0xff] %v560_v52  ;;  %1073 = vst [vmem:[#allocation5 + $0xd0] sm:$0xff] %v561_v53  ;;  %v566_v0 = vmax.f32 %v54_v61, 0.0  ;;  %v567_v1 = vmax.f32 %v55_v62, 0.0  ;;  %v56_v2 = vld [vmem:[#allocation2 + $0x108] sm:$0xff]  ;;  %v57_v3 = vld [vmem:[#allocation2 + $0x110] sm:$0xff] }
  0x1f   :  { %v58_v4 = vld [vmem:[#allocation2 + $0x118] sm:$0xff]  ;;  %1074 = vst [vmem:[#allocation5 + $0xd8] sm:$0xff] %v562_v57  ;;  %1075 = vst [vmem:[#allocation5 + $0xe0] sm:$0xff] %v563_v58  ;;  %v568_v5 = vmax.f32 %v56_v2, 0.0  ;;  %v569_v6 = vmax.f32 %v57_v3, 0.0  ;;  %v59_v8 = vld [vmem:[#allocation2 + $0x120] sm:$0xff] }
  0x20   :  { %1076 = vst [vmem:[#allocation5 + $0xe8] sm:$0xff] %v564_v59  ;;  %v570_v7 = vmax.f32 %v58_v4, 0.0  ;;  %v60_v9 = vld [vmem:[#allocation2 + $0x128] sm:$0xff]  ;;  %v61_v10 = vld [vmem:[#allocation2 + $0x130] sm:$0xff]  ;;  %1077 = vst [vmem:[#allocation5 + $0xf0] sm:$0xff] %v565_v63  ;;  %v571_v11 = vmax.f32 %v59_v8, 0.0 }
  0x21   :  { %1078 = vst [vmem:[#allocation5 + $0xf8] sm:$0xff] %v566_v0  ;;  %1079 = vst [vmem:[#allocation5 + $0x100] sm:$0xff] %v567_v1  ;;  %v572_v12 = vmax.f32 %v60_v9, 0.0  ;;  %v573_v13 = vmax.f32 %v61_v10, 0.0  ;;  %v62_v14 = vld [vmem:[#allocation2 + $0x138] sm:$0xff]  ;;  %v63_v15 = vld [vmem:[#allocation2 + $0x140] sm:$0xff] }
  0x22   :  { %v64_v16 = vld [vmem:[#allocation2 + $0x148] sm:$0xff]  ;;  %1080 = vst [vmem:[#allocation5 + $0x108] sm:$0xff] %v568_v5  ;;  %1081 = vst [vmem:[#allocation5 + $0x110] sm:$0xff] %v569_v6  ;;  %v574_v17 = vmax.f32 %v62_v14, 0.0  ;;  %v575_v18 = vmax.f32 %v63_v15, 0.0  ;;  %v65_v20 = vld [vmem:[#allocation2 + $0x150] sm:$0xff] }
  0x23   :  { %1082 = vst [vmem:[#allocation5 + $0x118] sm:$0xff] %v570_v7  ;;  %v576_v19 = vmax.f32 %v64_v16, 0.0  ;;  %v66_v21 = vld [vmem:[#allocation2 + $0x158] sm:$0xff]  ;;  %v67_v22 = vld [vmem:[#allocation2 + $0x160] sm:$0xff]  ;;  %1083 = vst [vmem:[#allocation5 + $0x120] sm:$0xff] %v571_v11  ;;  %v577_v23 = vmax.f32 %v65_v20, 0.0 }
  0x24   :  { %1084 = vst [vmem:[#allocation5 + $0x128] sm:$0xff] %v572_v12  ;;  %1085 = vst [vmem:[#allocation5 + $0x130] sm:$0xff] %v573_v13  ;;  %v578_v24 = vmax.f32 %v66_v21, 0.0  ;;  %v579_v25 = vmax.f32 %v67_v22, 0.0  ;;  %v68_v26 = vld [vmem:[#allocation2 + $0x168] sm:$0xff]  ;;  %v69_v27 = vld [vmem:[#allocation2 + $0x170] sm:$0xff] }
  0x25   :  { %v70_v28 = vld [vmem:[#allocation2 + $0x178] sm:$0xff]  ;;  %1086 = vst [vmem:[#allocation5 + $0x138] sm:$0xff] %v574_v17  ;;  %1087 = vst [vmem:[#allocation5 + $0x140] sm:$0xff] %v575_v18  ;;  %v580_v29 = vmax.f32 %v68_v26, 0.0  ;;  %v581_v30 = vmax.f32 %v69_v27, 0.0  ;;  %v71_v32 = vld [vmem:[#allocation2 + $0x180] sm:$0xff] }
  0x26   :  { %1088 = vst [vmem:[#allocation5 + $0x148] sm:$0xff] %v576_v19  ;;  %v582_v31 = vmax.f32 %v70_v28, 0.0  ;;  %v72_v33 = vld [vmem:[#allocation2 + $0x188] sm:$0xff]  ;;  %v73_v34 = vld [vmem:[#allocation2 + $0x190] sm:$0xff]  ;;  %1089 = vst [vmem:[#allocation5 + $0x150] sm:$0xff] %v577_v23  ;;  %v583_v35 = vmax.f32 %v71_v32, 0.0 }
  0x27   :  { %1090 = vst [vmem:[#allocation5 + $0x158] sm:$0xff] %v578_v24  ;;  %1091 = vst [vmem:[#allocation5 + $0x160] sm:$0xff] %v579_v25  ;;  %v584_v36 = vmax.f32 %v72_v33, 0.0  ;;  %v585_v37 = vmax.f32 %v73_v34, 0.0  ;;  %v74_v38 = vld [vmem:[#allocation2 + $0x198] sm:$0xff]  ;;  %v75_v39 = vld [vmem:[#allocation2 + $0x1a0] sm:$0xff] }
  0x28   :  { %v76_v40 = vld [vmem:[#allocation2 + $0x1a8] sm:$0xff]  ;;  %1092 = vst [vmem:[#allocation5 + $0x168] sm:$0xff] %v580_v29  ;;  %1093 = vst [vmem:[#allocation5 + $0x170] sm:$0xff] %v581_v30  ;;  %v586_v41 = vmax.f32 %v74_v38, 0.0  ;;  %v587_v42 = vmax.f32 %v75_v39, 0.0  ;;  %v77_v44 = vld [vmem:[#allocation2 + $0x1b0] sm:$0xff] }
  0x29   :  { %1094 = vst [vmem:[#allocation5 + $0x178] sm:$0xff] %v582_v31  ;;  %v588_v43 = vmax.f32 %v76_v40, 0.0  ;;  %v78_v45 = vld [vmem:[#allocation2 + $0x1b8] sm:$0xff]  ;;  %v79_v46 = vld [vmem:[#allocation2 + $0x1c0] sm:$0xff]  ;;  %1095 = vst [vmem:[#allocation5 + $0x180] sm:$0xff] %v583_v35  ;;  %v589_v47 = vmax.f32 %v77_v44, 0.0 }
  0x2a   :  { %1096 = vst [vmem:[#allocation5 + $0x188] sm:$0xff] %v584_v36  ;;  %1097 = vst [vmem:[#allocation5 + $0x190] sm:$0xff] %v585_v37  ;;  %v590_v48 = vmax.f32 %v78_v45, 0.0  ;;  %v591_v49 = vmax.f32 %v79_v46, 0.0  ;;  %v80_v50 = vld [vmem:[#allocation2 + $0x1c8] sm:$0xff]  ;;  %v81_v51 = vld [vmem:[#allocation2 + $0x1d0] sm:$0xff] }
  0x2b   :  { %v82_v52 = vld [vmem:[#allocation2 + $0x1d8] sm:$0xff]  ;;  %1098 = vst [vmem:[#allocation5 + $0x198] sm:$0xff] %v586_v41  ;;  %1099 = vst [vmem:[#allocation5 + $0x1a0] sm:$0xff] %v587_v42  ;;  %v592_v53 = vmax.f32 %v80_v50, 0.0  ;;  %v593_v54 = vmax.f32 %v81_v51, 0.0  ;;  %v83_v56 = vld [vmem:[#allocation2 + $0x1e0] sm:$0xff] }
  0x2c   :  { %1100 = vst [vmem:[#allocation5 + $0x1a8] sm:$0xff] %v588_v43  ;;  %v594_v55 = vmax.f32 %v82_v52, 0.0  ;;  %v84_v57 = vld [vmem:[#allocation2 + $0x1e8] sm:$0xff]  ;;  %v85_v58 = vld [vmem:[#allocation2 + $0x1f0] sm:$0xff]  ;;  %1101 = vst [vmem:[#allocation5 + $0x1b0] sm:$0xff] %v589_v47  ;;  %v595_v59 = vmax.f32 %v83_v56, 0.0 }
  0x2d   :  { %1102 = vst [vmem:[#allocation5 + $0x1b8] sm:$0xff] %v590_v48  ;;  %1103 = vst [vmem:[#allocation5 + $0x1c0] sm:$0xff] %v591_v49  ;;  %v596_v60 = vmax.f32 %v84_v57, 0.0  ;;  %v597_v61 = vmax.f32 %v85_v58, 0.0  ;;  %v86_v62 = vld [vmem:[#allocation2 + $0x1f8] sm:$0xff]  ;;  %v87_v63 = vld [vmem:[#allocation2 + $0x200] sm:$0xff] }
  0x2e   :  { %v88_v0 = vld [vmem:[#allocation2 + $0x208] sm:$0xff]  ;;  %1104 = vst [vmem:[#allocation5 + $0x1c8] sm:$0xff] %v592_v53  ;;  %1105 = vst [vmem:[#allocation5 + $0x1d0] sm:$0xff] %v593_v54  ;;  %v598_v1 = vmax.f32 %v86_v62, 0.0  ;;  %v599_v2 = vmax.f32 %v87_v63, 0.0  ;;  %v89_v4 = vld [vmem:[#allocation2 + $0x210] sm:$0xff] }
  0x2f   :  { %1106 = vst [vmem:[#allocation5 + $0x1d8] sm:$0xff] %v594_v55  ;;  %v600_v3 = vmax.f32 %v88_v0, 0.0  ;;  %v90_v5 = vld [vmem:[#allocation2 + $0x218] sm:$0xff]  ;;  %v91_v6 = vld [vmem:[#allocation2 + $0x220] sm:$0xff]  ;;  %1107 = vst [vmem:[#allocation5 + $0x1e0] sm:$0xff] %v595_v59  ;;  %v601_v7 = vmax.f32 %v89_v4, 0.0 }
  0x30   :  { %1108 = vst [vmem:[#allocation5 + $0x1e8] sm:$0xff] %v596_v60  ;;  %1109 = vst [vmem:[#allocation5 + $0x1f0] sm:$0xff] %v597_v61  ;;  %v602_v8 = vmax.f32 %v90_v5, 0.0  ;;  %v603_v9 = vmax.f32 %v91_v6, 0.0  ;;  %v92_v10 = vld [vmem:[#allocation2 + $0x228] sm:$0xff]  ;;  %v93_v11 = vld [vmem:[#allocation2 + $0x230] sm:$0xff] }
  0x31   :  { %v94_v12 = vld [vmem:[#allocation2 + $0x238] sm:$0xff]  ;;  %1110 = vst [vmem:[#allocation5 + $0x1f8] sm:$0xff] %v598_v1  ;;  %1111 = vst [vmem:[#allocation5 + $0x200] sm:$0xff] %v599_v2  ;;  %v604_v13 = vmax.f32 %v92_v10, 0.0  ;;  %v605_v14 = vmax.f32 %v93_v11, 0.0  ;;  %v95_v16 = vld [vmem:[#allocation2 + $0x240] sm:$0xff] }
  0x32   :  { %1112 = vst [vmem:[#allocation5 + $0x208] sm:$0xff] %v600_v3  ;;  %v606_v15 = vmax.f32 %v94_v12, 0.0  ;;  %v96_v17 = vld [vmem:[#allocation2 + $0x248] sm:$0xff]  ;;  %v97_v18 = vld [vmem:[#allocation2 + $0x250] sm:$0xff]  ;;  %1113 = vst [vmem:[#allocation5 + $0x210] sm:$0xff] %v601_v7  ;;  %v607_v19 = vmax.f32 %v95_v16, 0.0 }
  0x33   :  { %1114 = vst [vmem:[#allocation5 + $0x218] sm:$0xff] %v602_v8  ;;  %1115 = vst [vmem:[#allocation5 + $0x220] sm:$0xff] %v603_v9  ;;  %v608_v20 = vmax.f32 %v96_v17, 0.0  ;;  %v609_v21 = vmax.f32 %v97_v18, 0.0  ;;  %v98_v22 = vld [vmem:[#allocation2 + $0x258] sm:$0xff]  ;;  %v99_v23 = vld [vmem:[#allocation2 + $0x260] sm:$0xff] }
  0x34   :  { %v100_v24 = vld [vmem:[#allocation2 + $0x268] sm:$0xff]  ;;  %1116 = vst [vmem:[#allocation5 + $0x228] sm:$0xff] %v604_v13  ;;  %1117 = vst [vmem:[#allocation5 + $0x230] sm:$0xff] %v605_v14  ;;  %v610_v25 = vmax.f32 %v98_v22, 0.0  ;;  %v611_v26 = vmax.f32 %v99_v23, 0.0  ;;  %v101_v28 = vld [vmem:[#allocation2 + $0x270] sm:$0xff] }
  0x35   :  { %1118 = vst [vmem:[#allocation5 + $0x238] sm:$0xff] %v606_v15  ;;  %v612_v27 = vmax.f32 %v100_v24, 0.0  ;;  %v102_v29 = vld [vmem:[#allocation2 + $0x278] sm:$0xff]  ;;  %v103_v30 = vld [vmem:[#allocation2 + $0x280] sm:$0xff]  ;;  %1119 = vst [vmem:[#allocation5 + $0x240] sm:$0xff] %v607_v19  ;;  %v613_v31 = vmax.f32 %v101_v28, 0.0 }
  0x36   :  { %1120 = vst [vmem:[#allocation5 + $0x248] sm:$0xff] %v608_v20  ;;  %1121 = vst [vmem:[#allocation5 + $0x250] sm:$0xff] %v609_v21  ;;  %v614_v32 = vmax.f32 %v102_v29, 0.0  ;;  %v615_v33 = vmax.f32 %v103_v30, 0.0  ;;  %v104_v34 = vld [vmem:[#allocation2 + $0x288] sm:$0xff]  ;;  %v105_v35 = vld [vmem:[#allocation2 + $0x290] sm:$0xff] }
  0x37   :  { %v106_v36 = vld [vmem:[#allocation2 + $0x298] sm:$0xff]  ;;  %1122 = vst [vmem:[#allocation5 + $0x258] sm:$0xff] %v610_v25  ;;  %1123 = vst [vmem:[#allocation5 + $0x260] sm:$0xff] %v611_v26  ;;  %v616_v37 = vmax.f32 %v104_v34, 0.0  ;;  %v617_v38 = vmax.f32 %v105_v35, 0.0  ;;  %v107_v40 = vld [vmem:[#allocation2 + $0x2a0] sm:$0xff] }
  0x38   :  { %1124 = vst [vmem:[#allocation5 + $0x268] sm:$0xff] %v612_v27  ;;  %v618_v39 = vmax.f32 %v106_v36, 0.0  ;;  %v108_v41 = vld [vmem:[#allocation2 + $0x2a8] sm:$0xff]  ;;  %v109_v42 = vld [vmem:[#allocation2 + $0x2b0] sm:$0xff]  ;;  %1125 = vst [vmem:[#allocation5 + $0x270] sm:$0xff] %v613_v31  ;;  %v619_v43 = vmax.f32 %v107_v40, 0.0 }
  0x39   :  { %1126 = vst [vmem:[#allocation5 + $0x278] sm:$0xff] %v614_v32  ;;  %1127 = vst [vmem:[#allocation5 + $0x280] sm:$0xff] %v615_v33  ;;  %v620_v44 = vmax.f32 %v108_v41, 0.0  ;;  %v621_v45 = vmax.f32 %v109_v42, 0.0  ;;  %v110_v46 = vld [vmem:[#allocation2 + $0x2b8] sm:$0xff]  ;;  %v111_v47 = vld [vmem:[#allocation2 + $0x2c0] sm:$0xff] }
  0x3a   :  { %v112_v48 = vld [vmem:[#allocation2 + $0x2c8] sm:$0xff]  ;;  %1128 = vst [vmem:[#allocation5 + $0x288] sm:$0xff] %v616_v37  ;;  %1129 = vst [vmem:[#allocation5 + $0x290] sm:$0xff] %v617_v38  ;;  %v622_v49 = vmax.f32 %v110_v46, 0.0  ;;  %v623_v50 = vmax.f32 %v111_v47, 0.0  ;;  %v113_v52 = vld [vmem:[#allocation2 + $0x2d0] sm:$0xff] }
  0x3b   :  { %1130 = vst [vmem:[#allocation5 + $0x298] sm:$0xff] %v618_v39  ;;  %v624_v51 = vmax.f32 %v112_v48, 0.0  ;;  %v114_v53 = vld [vmem:[#allocation2 + $0x2d8] sm:$0xff]  ;;  %v115_v54 = vld [vmem:[#allocation2 + $0x2e0] sm:$0xff]  ;;  %1131 = vst [vmem:[#allocation5 + $0x2a0] sm:$0xff] %v619_v43  ;;  %v625_v55 = vmax.f32 %v113_v52, 0.0 }
  0x3c   :  { %1132 = vst [vmem:[#allocation5 + $0x2a8] sm:$0xff] %v620_v44  ;;  %1133 = vst [vmem:[#allocation5 + $0x2b0] sm:$0xff] %v621_v45  ;;  %v626_v56 = vmax.f32 %v114_v53, 0.0  ;;  %v627_v57 = vmax.f32 %v115_v54, 0.0  ;;  %v116_v58 = vld [vmem:[#allocation2 + $0x2e8] sm:$0xff]  ;;  %v117_v59 = vld [vmem:[#allocation2 + $0x2f0] sm:$0xff] }
  0x3d   :  { %v118_v60 = vld [vmem:[#allocation2 + $0x2f8] sm:$0xff]  ;;  %1134 = vst [vmem:[#allocation5 + $0x2b8] sm:$0xff] %v622_v49  ;;  %1135 = vst [vmem:[#allocation5 + $0x2c0] sm:$0xff] %v623_v50  ;;  %v628_v61 = vmax.f32 %v116_v58, 0.0  ;;  %v629_v62 = vmax.f32 %v117_v59, 0.0  ;;  %v119_v0 = vld [vmem:[#allocation2 + $0x300] sm:$0xff] }
  0x3e   :  { %1136 = vst [vmem:[#allocation5 + $0x2c8] sm:$0xff] %v624_v51  ;;  %v630_v63 = vmax.f32 %v118_v60, 0.0  ;;  %v120_v1 = vld [vmem:[#allocation2 + $0x308] sm:$0xff]  ;;  %v121_v2 = vld [vmem:[#allocation2 + $0x310] sm:$0xff]  ;;  %1137 = vst [vmem:[#allocation5 + $0x2d0] sm:$0xff] %v625_v55  ;;  %v631_v3 = vmax.f32 %v119_v0, 0.0 }
  0x3f   :  { %1138 = vst [vmem:[#allocation5 + $0x2d8] sm:$0xff] %v626_v56  ;;  %1139 = vst [vmem:[#allocation5 + $0x2e0] sm:$0xff] %v627_v57  ;;  %v632_v4 = vmax.f32 %v120_v1, 0.0  ;;  %v633_v5 = vmax.f32 %v121_v2, 0.0  ;;  %v122_v6 = vld [vmem:[#allocation2 + $0x318] sm:$0xff]  ;;  %v123_v7 = vld [vmem:[#allocation2 + $0x320] sm:$0xff] }
  0x40   :  { %v124_v8 = vld [vmem:[#allocation2 + $0x328] sm:$0xff]  ;;  %1140 = vst [vmem:[#allocation5 + $0x2e8] sm:$0xff] %v628_v61  ;;  %1141 = vst [vmem:[#allocation5 + $0x2f0] sm:$0xff] %v629_v62  ;;  %v634_v9 = vmax.f32 %v122_v6, 0.0  ;;  %v635_v10 = vmax.f32 %v123_v7, 0.0  ;;  %v125_v12 = vld [vmem:[#allocation2 + $0x330] sm:$0xff] }
  0x41   :  { %1142 = vst [vmem:[#allocation5 + $0x2f8] sm:$0xff] %v630_v63  ;;  %v636_v11 = vmax.f32 %v124_v8, 0.0  ;;  %v126_v13 = vld [vmem:[#allocation2 + $0x338] sm:$0xff]  ;;  %v127_v14 = vld [vmem:[#allocation2 + $0x340] sm:$0xff]  ;;  %1143 = vst [vmem:[#allocation5 + $0x300] sm:$0xff] %v631_v3  ;;  %v637_v15 = vmax.f32 %v125_v12, 0.0 }
  0x42   :  { %1144 = vst [vmem:[#allocation5 + $0x308] sm:$0xff] %v632_v4  ;;  %1145 = vst [vmem:[#allocation5 + $0x310] sm:$0xff] %v633_v5  ;;  %v638_v16 = vmax.f32 %v126_v13, 0.0  ;;  %v639_v17 = vmax.f32 %v127_v14, 0.0  ;;  %v128_v18 = vld [vmem:[#allocation2 + $0x348] sm:$0xff]  ;;  %v129_v19 = vld [vmem:[#allocation2 + $0x350] sm:$0xff] }
  0x43   :  { %v130_v20 = vld [vmem:[#allocation2 + $0x358] sm:$0xff]  ;;  %1146 = vst [vmem:[#allocation5 + $0x318] sm:$0xff] %v634_v9  ;;  %1147 = vst [vmem:[#allocation5 + $0x320] sm:$0xff] %v635_v10  ;;  %v640_v21 = vmax.f32 %v128_v18, 0.0  ;;  %v641_v22 = vmax.f32 %v129_v19, 0.0  ;;  %v131_v24 = vld [vmem:[#allocation2 + $0x360] sm:$0xff] }
  0x44   :  { %1148 = vst [vmem:[#allocation5 + $0x328] sm:$0xff] %v636_v11  ;;  %v642_v23 = vmax.f32 %v130_v20, 0.0  ;;  %v132_v25 = vld [vmem:[#allocation2 + $0x368] sm:$0xff]  ;;  %v133_v26 = vld [vmem:[#allocation2 + $0x370] sm:$0xff]  ;;  %1149 = vst [vmem:[#allocation5 + $0x330] sm:$0xff] %v637_v15  ;;  %v643_v27 = vmax.f32 %v131_v24, 0.0 }
  0x45   :  { %1150 = vst [vmem:[#allocation5 + $0x338] sm:$0xff] %v638_v16  ;;  %1151 = vst [vmem:[#allocation5 + $0x340] sm:$0xff] %v639_v17  ;;  %v644_v28 = vmax.f32 %v132_v25, 0.0  ;;  %v645_v29 = vmax.f32 %v133_v26, 0.0  ;;  %v134_v30 = vld [vmem:[#allocation2 + $0x378] sm:$0xff]  ;;  %v135_v31 = vld [vmem:[#allocation2 + $0x380] sm:$0xff] }
  0x46   :  { %v136_v32 = vld [vmem:[#allocation2 + $0x388] sm:$0xff]  ;;  %1152 = vst [vmem:[#allocation5 + $0x348] sm:$0xff] %v640_v21  ;;  %1153 = vst [vmem:[#allocation5 + $0x350] sm:$0xff] %v641_v22  ;;  %v646_v33 = vmax.f32 %v134_v30, 0.0  ;;  %v647_v34 = vmax.f32 %v135_v31, 0.0  ;;  %v137_v36 = vld [vmem:[#allocation2 + $0x390] sm:$0xff] }
  0x47   :  { %1154 = vst [vmem:[#allocation5 + $0x358] sm:$0xff] %v642_v23  ;;  %v648_v35 = vmax.f32 %v136_v32, 0.0  ;;  %v138_v37 = vld [vmem:[#allocation2 + $0x398] sm:$0xff]  ;;  %v139_v38 = vld [vmem:[#allocation2 + $0x3a0] sm:$0xff]  ;;  %1155 = vst [vmem:[#allocation5 + $0x360] sm:$0xff] %v643_v27  ;;  %v649_v39 = vmax.f32 %v137_v36, 0.0 }
  0x48   :  { %1156 = vst [vmem:[#allocation5 + $0x368] sm:$0xff] %v644_v28  ;;  %1157 = vst [vmem:[#allocation5 + $0x370] sm:$0xff] %v645_v29  ;;  %v650_v40 = vmax.f32 %v138_v37, 0.0  ;;  %v651_v41 = vmax.f32 %v139_v38, 0.0  ;;  %v140_v42 = vld [vmem:[#allocation2 + $0x3a8] sm:$0xff]  ;;  %v141_v43 = vld [vmem:[#allocation2 + $0x3b0] sm:$0xff] }
  0x49   :  { %v142_v44 = vld [vmem:[#allocation2 + $0x3b8] sm:$0xff]  ;;  %1158 = vst [vmem:[#allocation5 + $0x378] sm:$0xff] %v646_v33  ;;  %1159 = vst [vmem:[#allocation5 + $0x380] sm:$0xff] %v647_v34  ;;  %v652_v45 = vmax.f32 %v140_v42, 0.0  ;;  %v653_v46 = vmax.f32 %v141_v43, 0.0  ;;  %v143_v48 = vld [vmem:[#allocation2 + $0x3c0] sm:$0xff] }
  0x4a   :  { %1160 = vst [vmem:[#allocation5 + $0x388] sm:$0xff] %v648_v35  ;;  %v654_v47 = vmax.f32 %v142_v44, 0.0  ;;  %v144_v49 = vld [vmem:[#allocation2 + $0x3c8] sm:$0xff]  ;;  %v145_v50 = vld [vmem:[#allocation2 + $0x3d0] sm:$0xff]  ;;  %1161 = vst [vmem:[#allocation5 + $0x390] sm:$0xff] %v649_v39  ;;  %v655_v51 = vmax.f32 %v143_v48, 0.0 }
  0x4b   :  { %1162 = vst [vmem:[#allocation5 + $0x398] sm:$0xff] %v650_v40  ;;  %1163 = vst [vmem:[#allocation5 + $0x3a0] sm:$0xff] %v651_v41  ;;  %v656_v52 = vmax.f32 %v144_v49, 0.0  ;;  %v657_v53 = vmax.f32 %v145_v50, 0.0  ;;  %v146_v54 = vld [vmem:[#allocation2 + $0x3d8] sm:$0xff]  ;;  %v147_v55 = vld [vmem:[#allocation2 + $0x3e0] sm:$0xff] }
  0x4c   :  { %v148_v56 = vld [vmem:[#allocation2 + $0x3e8] sm:$0xff]  ;;  %1164 = vst [vmem:[#allocation5 + $0x3a8] sm:$0xff] %v652_v45  ;;  %1165 = vst [vmem:[#allocation5 + $0x3b0] sm:$0xff] %v653_v46  ;;  %v658_v57 = vmax.f32 %v146_v54, 0.0  ;;  %v659_v58 = vmax.f32 %v147_v55, 0.0  ;;  %v149_v60 = vld [vmem:[#allocation2 + $0x3f0] sm:$0xff] }
  0x4d   :  { %1166 = vst [vmem:[#allocation5 + $0x3b8] sm:$0xff] %v654_v47  ;;  %v660_v59 = vmax.f32 %v148_v56, 0.0  ;;  %v150_v61 = vld [vmem:[#allocation2 + $0x3f8] sm:$0xff]  ;;  %v151_v62 = vld [vmem:[#allocation2 + $0x400] sm:$0xff]  ;;  %1167 = vst [vmem:[#allocation5 + $0x3c0] sm:$0xff] %v655_v51  ;;  %v661_v63 = vmax.f32 %v149_v60, 0.0 }
  0x4e   :  { %1168 = vst [vmem:[#allocation5 + $0x3c8] sm:$0xff] %v656_v52  ;;  %1169 = vst [vmem:[#allocation5 + $0x3d0] sm:$0xff] %v657_v53  ;;  %v662_v0 = vmax.f32 %v150_v61, 0.0  ;;  %v663_v1 = vmax.f32 %v151_v62, 0.0  ;;  %v152_v2 = vld [vmem:[#allocation2 + $0x408] sm:$0xff]  ;;  %v153_v3 = vld [vmem:[#allocation2 + $0x410] sm:$0xff] }
  0x4f   :  { %v154_v4 = vld [vmem:[#allocation2 + $0x418] sm:$0xff]  ;;  %1170 = vst [vmem:[#allocation5 + $0x3d8] sm:$0xff] %v658_v57  ;;  %1171 = vst [vmem:[#allocation5 + $0x3e0] sm:$0xff] %v659_v58  ;;  %v664_v5 = vmax.f32 %v152_v2, 0.0  ;;  %v665_v6 = vmax.f32 %v153_v3, 0.0  ;;  %v155_v8 = vld [vmem:[#allocation2 + $0x420] sm:$0xff] }
  0x50   :  { %1172 = vst [vmem:[#allocation5 + $0x3e8] sm:$0xff] %v660_v59  ;;  %v666_v7 = vmax.f32 %v154_v4, 0.0  ;;  %v156_v9 = vld [vmem:[#allocation2 + $0x428] sm:$0xff]  ;;  %v157_v10 = vld [vmem:[#allocation2 + $0x430] sm:$0xff]  ;;  %1173 = vst [vmem:[#allocation5 + $0x3f0] sm:$0xff] %v661_v63  ;;  %v667_v11 = vmax.f32 %v155_v8, 0.0 }
  0x51   :  { %1174 = vst [vmem:[#allocation5 + $0x3f8] sm:$0xff] %v662_v0  ;;  %1175 = vst [vmem:[#allocation5 + $0x400] sm:$0xff] %v663_v1  ;;  %v668_v12 = vmax.f32 %v156_v9, 0.0  ;;  %v669_v13 = vmax.f32 %v157_v10, 0.0  ;;  %v158_v14 = vld [vmem:[#allocation2 + $0x438] sm:$0xff]  ;;  %v159_v15 = vld [vmem:[#allocation2 + $0x440] sm:$0xff] }
  0x52   :  { %v160_v16 = vld [vmem:[#allocation2 + $0x448] sm:$0xff]  ;;  %1176 = vst [vmem:[#allocation5 + $0x408] sm:$0xff] %v664_v5  ;;  %1177 = vst [vmem:[#allocation5 + $0x410] sm:$0xff] %v665_v6  ;;  %v670_v17 = vmax.f32 %v158_v14, 0.0  ;;  %v671_v18 = vmax.f32 %v159_v15, 0.0  ;;  %v161_v20 = vld [vmem:[#allocation2 + $0x450] sm:$0xff] }
  0x53   :  { %1178 = vst [vmem:[#allocation5 + $0x418] sm:$0xff] %v666_v7  ;;  %v672_v19 = vmax.f32 %v160_v16, 0.0  ;;  %v162_v21 = vld [vmem:[#allocation2 + $0x458] sm:$0xff]  ;;  %v163_v22 = vld [vmem:[#allocation2 + $0x460] sm:$0xff]  ;;  %1179 = vst [vmem:[#allocation5 + $0x420] sm:$0xff] %v667_v11  ;;  %v673_v23 = vmax.f32 %v161_v20, 0.0 }
  0x54   :  { %1180 = vst [vmem:[#allocation5 + $0x428] sm:$0xff] %v668_v12  ;;  %1181 = vst [vmem:[#allocation5 + $0x430] sm:$0xff] %v669_v13  ;;  %v674_v24 = vmax.f32 %v162_v21, 0.0  ;;  %v675_v25 = vmax.f32 %v163_v22, 0.0  ;;  %v164_v26 = vld [vmem:[#allocation2 + $0x468] sm:$0xff]  ;;  %v165_v27 = vld [vmem:[#allocation2 + $0x470] sm:$0xff] }
  0x55   :  { %v166_v28 = vld [vmem:[#allocation2 + $0x478] sm:$0xff]  ;;  %1182 = vst [vmem:[#allocation5 + $0x438] sm:$0xff] %v670_v17  ;;  %1183 = vst [vmem:[#allocation5 + $0x440] sm:$0xff] %v671_v18  ;;  %v676_v29 = vmax.f32 %v164_v26, 0.0  ;;  %v677_v30 = vmax.f32 %v165_v27, 0.0  ;;  %v167_v32 = vld [vmem:[#allocation2 + $0x480] sm:$0xff] }
  0x56   :  { %1184 = vst [vmem:[#allocation5 + $0x448] sm:$0xff] %v672_v19  ;;  %v678_v31 = vmax.f32 %v166_v28, 0.0  ;;  %v168_v33 = vld [vmem:[#allocation2 + $0x488] sm:$0xff]  ;;  %v169_v34 = vld [vmem:[#allocation2 + $0x490] sm:$0xff]  ;;  %1185 = vst [vmem:[#allocation5 + $0x450] sm:$0xff] %v673_v23  ;;  %v679_v35 = vmax.f32 %v167_v32, 0.0 }
  0x57   :  { %1186 = vst [vmem:[#allocation5 + $0x458] sm:$0xff] %v674_v24  ;;  %1187 = vst [vmem:[#allocation5 + $0x460] sm:$0xff] %v675_v25  ;;  %v680_v36 = vmax.f32 %v168_v33, 0.0  ;;  %v681_v37 = vmax.f32 %v169_v34, 0.0  ;;  %v170_v38 = vld [vmem:[#allocation2 + $0x498] sm:$0xff]  ;;  %v171_v39 = vld [vmem:[#allocation2 + $0x4a0] sm:$0xff] }
  0x58   :  { %v172_v40 = vld [vmem:[#allocation2 + $0x4a8] sm:$0xff]  ;;  %1188 = vst [vmem:[#allocation5 + $0x468] sm:$0xff] %v676_v29  ;;  %1189 = vst [vmem:[#allocation5 + $0x470] sm:$0xff] %v677_v30  ;;  %v682_v41 = vmax.f32 %v170_v38, 0.0  ;;  %v683_v42 = vmax.f32 %v171_v39, 0.0  ;;  %v173_v44 = vld [vmem:[#allocation2 + $0x4b0] sm:$0xff] }
  0x59   :  { %1190 = vst [vmem:[#allocation5 + $0x478] sm:$0xff] %v678_v31  ;;  %v684_v43 = vmax.f32 %v172_v40, 0.0  ;;  %v174_v45 = vld [vmem:[#allocation2 + $0x4b8] sm:$0xff]  ;;  %v175_v46 = vld [vmem:[#allocation2 + $0x4c0] sm:$0xff]  ;;  %1191 = vst [vmem:[#allocation5 + $0x480] sm:$0xff] %v679_v35  ;;  %v685_v47 = vmax.f32 %v173_v44, 0.0 }
  0x5a   :  { %1192 = vst [vmem:[#allocation5 + $0x488] sm:$0xff] %v680_v36  ;;  %1193 = vst [vmem:[#allocation5 + $0x490] sm:$0xff] %v681_v37  ;;  %v686_v48 = vmax.f32 %v174_v45, 0.0  ;;  %v687_v49 = vmax.f32 %v175_v46, 0.0  ;;  %v176_v50 = vld [vmem:[#allocation2 + $0x4c8] sm:$0xff]  ;;  %v177_v51 = vld [vmem:[#allocation2 + $0x4d0] sm:$0xff] }
  0x5b   :  { %v178_v52 = vld [vmem:[#allocation2 + $0x4d8] sm:$0xff]  ;;  %1194 = vst [vmem:[#allocation5 + $0x498] sm:$0xff] %v682_v41  ;;  %1195 = vst [vmem:[#allocation5 + $0x4a0] sm:$0xff] %v683_v42  ;;  %v688_v53 = vmax.f32 %v176_v50, 0.0  ;;  %v689_v54 = vmax.f32 %v177_v51, 0.0  ;;  %v179_v56 = vld [vmem:[#allocation2 + $0x4e0] sm:$0xff] }
  0x5c   :  { %1196 = vst [vmem:[#allocation5 + $0x4a8] sm:$0xff] %v684_v43  ;;  %v690_v55 = vmax.f32 %v178_v52, 0.0  ;;  %v180_v57 = vld [vmem:[#allocation2 + $0x4e8] sm:$0xff]  ;;  %v181_v58 = vld [vmem:[#allocation2 + $0x4f0] sm:$0xff]  ;;  %1197 = vst [vmem:[#allocation5 + $0x4b0] sm:$0xff] %v685_v47  ;;  %v691_v59 = vmax.f32 %v179_v56, 0.0 }
  0x5d   :  { %1198 = vst [vmem:[#allocation5 + $0x4b8] sm:$0xff] %v686_v48  ;;  %1199 = vst [vmem:[#allocation5 + $0x4c0] sm:$0xff] %v687_v49  ;;  %v692_v60 = vmax.f32 %v180_v57, 0.0  ;;  %v693_v61 = vmax.f32 %v181_v58, 0.0  ;;  %v182_v62 = vld [vmem:[#allocation2 + $0x4f8] sm:$0xff]  ;;  %v183_v63 = vld [vmem:[#allocation2 + $0x500] sm:$0xff] }
  0x5e   :  { %v184_v0 = vld [vmem:[#allocation2 + $0x508] sm:$0xff]  ;;  %1200 = vst [vmem:[#allocation5 + $0x4c8] sm:$0xff] %v688_v53  ;;  %1201 = vst [vmem:[#allocation5 + $0x4d0] sm:$0xff] %v689_v54  ;;  %v694_v1 = vmax.f32 %v182_v62, 0.0  ;;  %v695_v2 = vmax.f32 %v183_v63, 0.0  ;;  %v185_v4 = vld [vmem:[#allocation2 + $0x510] sm:$0xff] }
  0x5f   :  { %1202 = vst [vmem:[#allocation5 + $0x4d8] sm:$0xff] %v690_v55  ;;  %v696_v3 = vmax.f32 %v184_v0, 0.0  ;;  %v186_v5 = vld [vmem:[#allocation2 + $0x518] sm:$0xff]  ;;  %v187_v6 = vld [vmem:[#allocation2 + $0x520] sm:$0xff]  ;;  %1203 = vst [vmem:[#allocation5 + $0x4e0] sm:$0xff] %v691_v59  ;;  %v697_v7 = vmax.f32 %v185_v4, 0.0 }
  0x60   :  { %1204 = vst [vmem:[#allocation5 + $0x4e8] sm:$0xff] %v692_v60  ;;  %1205 = vst [vmem:[#allocation5 + $0x4f0] sm:$0xff] %v693_v61  ;;  %v698_v8 = vmax.f32 %v186_v5, 0.0  ;;  %v699_v9 = vmax.f32 %v187_v6, 0.0  ;;  %v188_v10 = vld [vmem:[#allocation2 + $0x528] sm:$0xff]  ;;  %v189_v11 = vld [vmem:[#allocation2 + $0x530] sm:$0xff] }
  0x61   :  { %v190_v12 = vld [vmem:[#allocation2 + $0x538] sm:$0xff]  ;;  %1206 = vst [vmem:[#allocation5 + $0x4f8] sm:$0xff] %v694_v1  ;;  %1207 = vst [vmem:[#allocation5 + $0x500] sm:$0xff] %v695_v2  ;;  %v700_v13 = vmax.f32 %v188_v10, 0.0  ;;  %v701_v14 = vmax.f32 %v189_v11, 0.0  ;;  %v191_v16 = vld [vmem:[#allocation2 + $0x540] sm:$0xff] }
  0x62   :  { %1208 = vst [vmem:[#allocation5 + $0x508] sm:$0xff] %v696_v3  ;;  %v702_v15 = vmax.f32 %v190_v12, 0.0  ;;  %v192_v17 = vld [vmem:[#allocation2 + $0x548] sm:$0xff]  ;;  %v193_v18 = vld [vmem:[#allocation2 + $0x550] sm:$0xff]  ;;  %1209 = vst [vmem:[#allocation5 + $0x510] sm:$0xff] %v697_v7  ;;  %v703_v19 = vmax.f32 %v191_v16, 0.0 }
  0x63   :  { %1210 = vst [vmem:[#allocation5 + $0x518] sm:$0xff] %v698_v8  ;;  %1211 = vst [vmem:[#allocation5 + $0x520] sm:$0xff] %v699_v9  ;;  %v704_v20 = vmax.f32 %v192_v17, 0.0  ;;  %v705_v21 = vmax.f32 %v193_v18, 0.0  ;;  %v194_v22 = vld [vmem:[#allocation2 + $0x558] sm:$0xff]  ;;  %v195_v23 = vld [vmem:[#allocation2 + $0x560] sm:$0xff] }
  0x64   :  { %v196_v24 = vld [vmem:[#allocation2 + $0x568] sm:$0xff]  ;;  %1212 = vst [vmem:[#allocation5 + $0x528] sm:$0xff] %v700_v13  ;;  %1213 = vst [vmem:[#allocation5 + $0x530] sm:$0xff] %v701_v14  ;;  %v706_v25 = vmax.f32 %v194_v22, 0.0  ;;  %v707_v26 = vmax.f32 %v195_v23, 0.0  ;;  %v197_v28 = vld [vmem:[#allocation2 + $0x570] sm:$0xff] }
  0x65   :  { %1214 = vst [vmem:[#allocation5 + $0x538] sm:$0xff] %v702_v15  ;;  %v708_v27 = vmax.f32 %v196_v24, 0.0  ;;  %v198_v29 = vld [vmem:[#allocation2 + $0x578] sm:$0xff]  ;;  %v199_v30 = vld [vmem:[#allocation2 + $0x580] sm:$0xff]  ;;  %1215 = vst [vmem:[#allocation5 + $0x540] sm:$0xff] %v703_v19  ;;  %v709_v31 = vmax.f32 %v197_v28, 0.0 }
  0x66   :  { %1216 = vst [vmem:[#allocation5 + $0x548] sm:$0xff] %v704_v20  ;;  %1217 = vst [vmem:[#allocation5 + $0x550] sm:$0xff] %v705_v21  ;;  %v710_v32 = vmax.f32 %v198_v29, 0.0  ;;  %v711_v33 = vmax.f32 %v199_v30, 0.0  ;;  %v200_v34 = vld [vmem:[#allocation2 + $0x588] sm:$0xff]  ;;  %v201_v35 = vld [vmem:[#allocation2 + $0x590] sm:$0xff] }
  0x67   :  { %v202_v36 = vld [vmem:[#allocation2 + $0x598] sm:$0xff]  ;;  %1218 = vst [vmem:[#allocation5 + $0x558] sm:$0xff] %v706_v25  ;;  %1219 = vst [vmem:[#allocation5 + $0x560] sm:$0xff] %v707_v26  ;;  %v712_v37 = vmax.f32 %v200_v34, 0.0  ;;  %v713_v38 = vmax.f32 %v201_v35, 0.0  ;;  %v203_v40 = vld [vmem:[#allocation2 + $0x5a0] sm:$0xff] }
  0x68   :  { %1220 = vst [vmem:[#allocation5 + $0x568] sm:$0xff] %v708_v27  ;;  %v714_v39 = vmax.f32 %v202_v36, 0.0  ;;  %v204_v41 = vld [vmem:[#allocation2 + $0x5a8] sm:$0xff]  ;;  %v205_v42 = vld [vmem:[#allocation2 + $0x5b0] sm:$0xff]  ;;  %1221 = vst [vmem:[#allocation5 + $0x570] sm:$0xff] %v709_v31  ;;  %v715_v43 = vmax.f32 %v203_v40, 0.0 }
  0x69   :  { %1222 = vst [vmem:[#allocation5 + $0x578] sm:$0xff] %v710_v32  ;;  %1223 = vst [vmem:[#allocation5 + $0x580] sm:$0xff] %v711_v33  ;;  %v716_v44 = vmax.f32 %v204_v41, 0.0  ;;  %v717_v45 = vmax.f32 %v205_v42, 0.0  ;;  %v206_v46 = vld [vmem:[#allocation2 + $0x5b8] sm:$0xff]  ;;  %v207_v47 = vld [vmem:[#allocation2 + $0x5c0] sm:$0xff] }
  0x6a   :  { %v208_v48 = vld [vmem:[#allocation2 + $0x5c8] sm:$0xff]  ;;  %1224 = vst [vmem:[#allocation5 + $0x588] sm:$0xff] %v712_v37  ;;  %1225 = vst [vmem:[#allocation5 + $0x590] sm:$0xff] %v713_v38  ;;  %v718_v49 = vmax.f32 %v206_v46, 0.0  ;;  %v719_v50 = vmax.f32 %v207_v47, 0.0  ;;  %v209_v52 = vld [vmem:[#allocation2 + $0x5d0] sm:$0xff] }
  0x6b   :  { %1226 = vst [vmem:[#allocation5 + $0x598] sm:$0xff] %v714_v39  ;;  %v720_v51 = vmax.f32 %v208_v48, 0.0  ;;  %v210_v53 = vld [vmem:[#allocation2 + $0x5d8] sm:$0xff]  ;;  %v211_v54 = vld [vmem:[#allocation2 + $0x5e0] sm:$0xff]  ;;  %1227 = vst [vmem:[#allocation5 + $0x5a0] sm:$0xff] %v715_v43  ;;  %v721_v55 = vmax.f32 %v209_v52, 0.0 }
  0x6c   :  { %1228 = vst [vmem:[#allocation5 + $0x5a8] sm:$0xff] %v716_v44  ;;  %1229 = vst [vmem:[#allocation5 + $0x5b0] sm:$0xff] %v717_v45  ;;  %v722_v56 = vmax.f32 %v210_v53, 0.0  ;;  %v723_v57 = vmax.f32 %v211_v54, 0.0  ;;  %v212_v58 = vld [vmem:[#allocation2 + $0x5e8] sm:$0xff]  ;;  %v213_v59 = vld [vmem:[#allocation2 + $0x5f0] sm:$0xff] }
  0x6d   :  { %v214_v60 = vld [vmem:[#allocation2 + $0x5f8] sm:$0xff]  ;;  %1230 = vst [vmem:[#allocation5 + $0x5b8] sm:$0xff] %v718_v49  ;;  %1231 = vst [vmem:[#allocation5 + $0x5c0] sm:$0xff] %v719_v50  ;;  %v724_v61 = vmax.f32 %v212_v58, 0.0  ;;  %v725_v62 = vmax.f32 %v213_v59, 0.0  ;;  %v215_v0 = vld [vmem:[#allocation2 + $0x600] sm:$0xff] }
  0x6e   :  { %1232 = vst [vmem:[#allocation5 + $0x5c8] sm:$0xff] %v720_v51  ;;  %v726_v63 = vmax.f32 %v214_v60, 0.0  ;;  %v216_v1 = vld [vmem:[#allocation2 + $0x608] sm:$0xff]  ;;  %v217_v2 = vld [vmem:[#allocation2 + $0x610] sm:$0xff]  ;;  %1233 = vst [vmem:[#allocation5 + $0x5d0] sm:$0xff] %v721_v55  ;;  %v727_v3 = vmax.f32 %v215_v0, 0.0 }
  0x6f   :  { %1234 = vst [vmem:[#allocation5 + $0x5d8] sm:$0xff] %v722_v56  ;;  %1235 = vst [vmem:[#allocation5 + $0x5e0] sm:$0xff] %v723_v57  ;;  %v728_v4 = vmax.f32 %v216_v1, 0.0  ;;  %v729_v5 = vmax.f32 %v217_v2, 0.0  ;;  %v218_v6 = vld [vmem:[#allocation2 + $0x618] sm:$0xff]  ;;  %v219_v7 = vld [vmem:[#allocation2 + $0x620] sm:$0xff] }
  0x70   :  { %v220_v8 = vld [vmem:[#allocation2 + $0x628] sm:$0xff]  ;;  %1236 = vst [vmem:[#allocation5 + $0x5e8] sm:$0xff] %v724_v61  ;;  %1237 = vst [vmem:[#allocation5 + $0x5f0] sm:$0xff] %v725_v62  ;;  %v730_v9 = vmax.f32 %v218_v6, 0.0  ;;  %v731_v10 = vmax.f32 %v219_v7, 0.0  ;;  %v221_v12 = vld [vmem:[#allocation2 + $0x630] sm:$0xff] }
  0x71   :  { %1238 = vst [vmem:[#allocation5 + $0x5f8] sm:$0xff] %v726_v63  ;;  %v732_v11 = vmax.f32 %v220_v8, 0.0  ;;  %v222_v13 = vld [vmem:[#allocation2 + $0x638] sm:$0xff]  ;;  %v223_v14 = vld [vmem:[#allocation2 + $0x640] sm:$0xff]  ;;  %1239 = vst [vmem:[#allocation5 + $0x600] sm:$0xff] %v727_v3  ;;  %v733_v15 = vmax.f32 %v221_v12, 0.0 }
  0x72   :  { %1240 = vst [vmem:[#allocation5 + $0x608] sm:$0xff] %v728_v4  ;;  %1241 = vst [vmem:[#allocation5 + $0x610] sm:$0xff] %v729_v5  ;;  %v734_v16 = vmax.f32 %v222_v13, 0.0  ;;  %v735_v17 = vmax.f32 %v223_v14, 0.0  ;;  %v224_v18 = vld [vmem:[#allocation2 + $0x648] sm:$0xff]  ;;  %v225_v19 = vld [vmem:[#allocation2 + $0x650] sm:$0xff] }
  0x73   :  { %v226_v20 = vld [vmem:[#allocation2 + $0x658] sm:$0xff]  ;;  %1242 = vst [vmem:[#allocation5 + $0x618] sm:$0xff] %v730_v9  ;;  %1243 = vst [vmem:[#allocation5 + $0x620] sm:$0xff] %v731_v10  ;;  %v736_v21 = vmax.f32 %v224_v18, 0.0  ;;  %v737_v22 = vmax.f32 %v225_v19, 0.0  ;;  %v227_v24 = vld [vmem:[#allocation2 + $0x660] sm:$0xff] }
  0x74   :  { %1244 = vst [vmem:[#allocation5 + $0x628] sm:$0xff] %v732_v11  ;;  %v738_v23 = vmax.f32 %v226_v20, 0.0  ;;  %v228_v25 = vld [vmem:[#allocation2 + $0x668] sm:$0xff]  ;;  %v229_v26 = vld [vmem:[#allocation2 + $0x670] sm:$0xff]  ;;  %1245 = vst [vmem:[#allocation5 + $0x630] sm:$0xff] %v733_v15  ;;  %v739_v27 = vmax.f32 %v227_v24, 0.0 }
  0x75   :  { %1246 = vst [vmem:[#allocation5 + $0x638] sm:$0xff] %v734_v16  ;;  %1247 = vst [vmem:[#allocation5 + $0x640] sm:$0xff] %v735_v17  ;;  %v740_v28 = vmax.f32 %v228_v25, 0.0  ;;  %v741_v29 = vmax.f32 %v229_v26, 0.0  ;;  %v230_v30 = vld [vmem:[#allocation2 + $0x678] sm:$0xff]  ;;  %v231_v31 = vld [vmem:[#allocation2 + $0x680] sm:$0xff] }
  0x76   :  { %v232_v32 = vld [vmem:[#allocation2 + $0x688] sm:$0xff]  ;;  %1248 = vst [vmem:[#allocation5 + $0x648] sm:$0xff] %v736_v21  ;;  %1249 = vst [vmem:[#allocation5 + $0x650] sm:$0xff] %v737_v22  ;;  %v742_v33 = vmax.f32 %v230_v30, 0.0  ;;  %v743_v34 = vmax.f32 %v231_v31, 0.0  ;;  %v233_v36 = vld [vmem:[#allocation2 + $0x690] sm:$0xff] }
  0x77   :  { %1250 = vst [vmem:[#allocation5 + $0x658] sm:$0xff] %v738_v23  ;;  %v744_v35 = vmax.f32 %v232_v32, 0.0  ;;  %v234_v37 = vld [vmem:[#allocation2 + $0x698] sm:$0xff]  ;;  %v235_v38 = vld [vmem:[#allocation2 + $0x6a0] sm:$0xff]  ;;  %1251 = vst [vmem:[#allocation5 + $0x660] sm:$0xff] %v739_v27  ;;  %v745_v39 = vmax.f32 %v233_v36, 0.0 }
  0x78   :  { %1252 = vst [vmem:[#allocation5 + $0x668] sm:$0xff] %v740_v28  ;;  %1253 = vst [vmem:[#allocation5 + $0x670] sm:$0xff] %v741_v29  ;;  %v746_v40 = vmax.f32 %v234_v37, 0.0  ;;  %v747_v41 = vmax.f32 %v235_v38, 0.0  ;;  %v236_v42 = vld [vmem:[#allocation2 + $0x6a8] sm:$0xff]  ;;  %v237_v43 = vld [vmem:[#allocation2 + $0x6b0] sm:$0xff] }
  0x79   :  { %v238_v44 = vld [vmem:[#allocation2 + $0x6b8] sm:$0xff]  ;;  %1254 = vst [vmem:[#allocation5 + $0x678] sm:$0xff] %v742_v33  ;;  %1255 = vst [vmem:[#allocation5 + $0x680] sm:$0xff] %v743_v34  ;;  %v748_v45 = vmax.f32 %v236_v42, 0.0  ;;  %v749_v46 = vmax.f32 %v237_v43, 0.0  ;;  %v239_v48 = vld [vmem:[#allocation2 + $0x6c0] sm:$0xff] }
  0x7a   :  { %1256 = vst [vmem:[#allocation5 + $0x688] sm:$0xff] %v744_v35  ;;  %v750_v47 = vmax.f32 %v238_v44, 0.0  ;;  %v240_v49 = vld [vmem:[#allocation2 + $0x6c8] sm:$0xff]  ;;  %v241_v50 = vld [vmem:[#allocation2 + $0x6d0] sm:$0xff]  ;;  %1257 = vst [vmem:[#allocation5 + $0x690] sm:$0xff] %v745_v39  ;;  %v751_v51 = vmax.f32 %v239_v48, 0.0 }
  0x7b   :  { %1258 = vst [vmem:[#allocation5 + $0x698] sm:$0xff] %v746_v40  ;;  %1259 = vst [vmem:[#allocation5 + $0x6a0] sm:$0xff] %v747_v41  ;;  %v752_v52 = vmax.f32 %v240_v49, 0.0  ;;  %v753_v53 = vmax.f32 %v241_v50, 0.0  ;;  %v242_v54 = vld [vmem:[#allocation2 + $0x6d8] sm:$0xff]  ;;  %v243_v55 = vld [vmem:[#allocation2 + $0x6e0] sm:$0xff] }
  0x7c   :  { %v244_v56 = vld [vmem:[#allocation2 + $0x6e8] sm:$0xff]  ;;  %1260 = vst [vmem:[#allocation5 + $0x6a8] sm:$0xff] %v748_v45  ;;  %1261 = vst [vmem:[#allocation5 + $0x6b0] sm:$0xff] %v749_v46  ;;  %v754_v57 = vmax.f32 %v242_v54, 0.0  ;;  %v755_v58 = vmax.f32 %v243_v55, 0.0  ;;  %v245_v60 = vld [vmem:[#allocation2 + $0x6f0] sm:$0xff] }
  0x7d   :  { %1262 = vst [vmem:[#allocation5 + $0x6b8] sm:$0xff] %v750_v47  ;;  %v756_v59 = vmax.f32 %v244_v56, 0.0  ;;  %v246_v61 = vld [vmem:[#allocation2 + $0x6f8] sm:$0xff]  ;;  %v247_v62 = vld [vmem:[#allocation2 + $0x700] sm:$0xff]  ;;  %1263 = vst [vmem:[#allocation5 + $0x6c0] sm:$0xff] %v751_v51  ;;  %v757_v63 = vmax.f32 %v245_v60, 0.0 }
  0x7e   :  { %1264 = vst [vmem:[#allocation5 + $0x6c8] sm:$0xff] %v752_v52  ;;  %1265 = vst [vmem:[#allocation5 + $0x6d0] sm:$0xff] %v753_v53  ;;  %v758_v0 = vmax.f32 %v246_v61, 0.0  ;;  %v759_v1 = vmax.f32 %v247_v62, 0.0  ;;  %v248_v2 = vld [vmem:[#allocation2 + $0x708] sm:$0xff]  ;;  %v249_v3 = vld [vmem:[#allocation2 + $0x710] sm:$0xff] }
  0x7f   :  { %v250_v4 = vld [vmem:[#allocation2 + $0x718] sm:$0xff]  ;;  %1266 = vst [vmem:[#allocation5 + $0x6d8] sm:$0xff] %v754_v57  ;;  %1267 = vst [vmem:[#allocation5 + $0x6e0] sm:$0xff] %v755_v58  ;;  %v760_v5 = vmax.f32 %v248_v2, 0.0  ;;  %v761_v6 = vmax.f32 %v249_v3, 0.0  ;;  %v251_v8 = vld [vmem:[#allocation2 + $0x720] sm:$0xff] }
  0x80   :  { %1268 = vst [vmem:[#allocation5 + $0x6e8] sm:$0xff] %v756_v59  ;;  %v762_v7 = vmax.f32 %v250_v4, 0.0  ;;  %v252_v9 = vld [vmem:[#allocation2 + $0x728] sm:$0xff]  ;;  %v253_v10 = vld [vmem:[#allocation2 + $0x730] sm:$0xff]  ;;  %1269 = vst [vmem:[#allocation5 + $0x6f0] sm:$0xff] %v757_v63  ;;  %v763_v11 = vmax.f32 %v251_v8, 0.0 }
  0x81   :  { %1270 = vst [vmem:[#allocation5 + $0x6f8] sm:$0xff] %v758_v0  ;;  %1271 = vst [vmem:[#allocation5 + $0x700] sm:$0xff] %v759_v1  ;;  %v764_v12 = vmax.f32 %v252_v9, 0.0  ;;  %v765_v13 = vmax.f32 %v253_v10, 0.0  ;;  %v254_v14 = vld [vmem:[#allocation2 + $0x738] sm:$0xff]  ;;  %v255_v15 = vld [vmem:[#allocation2 + $0x740] sm:$0xff] }
  0x82   :  { %v256_v16 = vld [vmem:[#allocation2 + $0x748] sm:$0xff]  ;;  %1272 = vst [vmem:[#allocation5 + $0x708] sm:$0xff] %v760_v5  ;;  %1273 = vst [vmem:[#allocation5 + $0x710] sm:$0xff] %v761_v6  ;;  %v766_v17 = vmax.f32 %v254_v14, 0.0  ;;  %v767_v18 = vmax.f32 %v255_v15, 0.0  ;;  %v257_v20 = vld [vmem:[#allocation2 + $0x750] sm:$0xff] }
  0x83   :  { %1274 = vst [vmem:[#allocation5 + $0x718] sm:$0xff] %v762_v7  ;;  %v768_v19 = vmax.f32 %v256_v16, 0.0  ;;  %v258_v21 = vld [vmem:[#allocation2 + $0x758] sm:$0xff]  ;;  %v259_v22 = vld [vmem:[#allocation2 + $0x760] sm:$0xff]  ;;  %1275 = vst [vmem:[#allocation5 + $0x720] sm:$0xff] %v763_v11  ;;  %v769_v23 = vmax.f32 %v257_v20, 0.0 }
  0x84   :  { %1276 = vst [vmem:[#allocation5 + $0x728] sm:$0xff] %v764_v12  ;;  %1277 = vst [vmem:[#allocation5 + $0x730] sm:$0xff] %v765_v13  ;;  %v770_v24 = vmax.f32 %v258_v21, 0.0  ;;  %v771_v25 = vmax.f32 %v259_v22, 0.0  ;;  %v260_v26 = vld [vmem:[#allocation2 + $0x768] sm:$0xff]  ;;  %v261_v27 = vld [vmem:[#allocation2 + $0x770] sm:$0xff] }
  0x85   :  { %v262_v28 = vld [vmem:[#allocation2 + $0x778] sm:$0xff]  ;;  %1278 = vst [vmem:[#allocation5 + $0x738] sm:$0xff] %v766_v17  ;;  %1279 = vst [vmem:[#allocation5 + $0x740] sm:$0xff] %v767_v18  ;;  %v772_v29 = vmax.f32 %v260_v26, 0.0  ;;  %v773_v30 = vmax.f32 %v261_v27, 0.0  ;;  %v263_v32 = vld [vmem:[#allocation2 + $0x780] sm:$0xff] }
  0x86   :  { %1280 = vst [vmem:[#allocation5 + $0x748] sm:$0xff] %v768_v19  ;;  %v774_v31 = vmax.f32 %v262_v28, 0.0  ;;  %v264_v33 = vld [vmem:[#allocation2 + $0x788] sm:$0xff]  ;;  %v265_v34 = vld [vmem:[#allocation2 + $0x790] sm:$0xff]  ;;  %1281 = vst [vmem:[#allocation5 + $0x750] sm:$0xff] %v769_v23  ;;  %v775_v35 = vmax.f32 %v263_v32, 0.0 }
  0x87   :  { %1282 = vst [vmem:[#allocation5 + $0x758] sm:$0xff] %v770_v24  ;;  %1283 = vst [vmem:[#allocation5 + $0x760] sm:$0xff] %v771_v25  ;;  %v776_v36 = vmax.f32 %v264_v33, 0.0  ;;  %v777_v37 = vmax.f32 %v265_v34, 0.0  ;;  %v266_v38 = vld [vmem:[#allocation2 + $0x798] sm:$0xff]  ;;  %v267_v39 = vld [vmem:[#allocation2 + $0x7a0] sm:$0xff] }
  0x88   :  { %v268_v40 = vld [vmem:[#allocation2 + $0x7a8] sm:$0xff]  ;;  %1284 = vst [vmem:[#allocation5 + $0x768] sm:$0xff] %v772_v29  ;;  %1285 = vst [vmem:[#allocation5 + $0x770] sm:$0xff] %v773_v30  ;;  %v778_v41 = vmax.f32 %v266_v38, 0.0  ;;  %v779_v42 = vmax.f32 %v267_v39, 0.0  ;;  %v269_v44 = vld [vmem:[#allocation2 + $0x7b0] sm:$0xff] }
  0x89   :  { %1286 = vst [vmem:[#allocation5 + $0x778] sm:$0xff] %v774_v31  ;;  %v780_v43 = vmax.f32 %v268_v40, 0.0  ;;  %v270_v45 = vld [vmem:[#allocation2 + $0x7b8] sm:$0xff]  ;;  %v271_v46 = vld [vmem:[#allocation2 + $0x7c0] sm:$0xff]  ;;  %1287 = vst [vmem:[#allocation5 + $0x780] sm:$0xff] %v775_v35  ;;  %v781_v47 = vmax.f32 %v269_v44, 0.0 }
  0x8a   :  { %1288 = vst [vmem:[#allocation5 + $0x788] sm:$0xff] %v776_v36  ;;  %1289 = vst [vmem:[#allocation5 + $0x790] sm:$0xff] %v777_v37  ;;  %v782_v48 = vmax.f32 %v270_v45, 0.0  ;;  %v783_v49 = vmax.f32 %v271_v46, 0.0  ;;  %v272_v50 = vld [vmem:[#allocation2 + $0x7c8] sm:$0xff]  ;;  %v273_v51 = vld [vmem:[#allocation2 + $0x7d0] sm:$0xff] }
  0x8b   :  { %v274_v52 = vld [vmem:[#allocation2 + $0x7d8] sm:$0xff]  ;;  %1290 = vst [vmem:[#allocation5 + $0x798] sm:$0xff] %v778_v41  ;;  %1291 = vst [vmem:[#allocation5 + $0x7a0] sm:$0xff] %v779_v42  ;;  %v784_v53 = vmax.f32 %v272_v50, 0.0  ;;  %v785_v54 = vmax.f32 %v273_v51, 0.0  ;;  %v275_v56 = vld [vmem:[#allocation2 + $0x7e0] sm:$0xff] }
  0x8c   :  { %1292 = vst [vmem:[#allocation5 + $0x7a8] sm:$0xff] %v780_v43  ;;  %v786_v55 = vmax.f32 %v274_v52, 0.0  ;;  %v276_v57 = vld [vmem:[#allocation2 + $0x7e8] sm:$0xff]  ;;  %v277_v58 = vld [vmem:[#allocation2 + $0x7f0] sm:$0xff]  ;;  %1293 = vst [vmem:[#allocation5 + $0x7b0] sm:$0xff] %v781_v47  ;;  %v787_v59 = vmax.f32 %v275_v56, 0.0 }
  0x8d   :  { %1294 = vst [vmem:[#allocation5 + $0x7b8] sm:$0xff] %v782_v48  ;;  %1295 = vst [vmem:[#allocation5 + $0x7c0] sm:$0xff] %v783_v49  ;;  %v788_v60 = vmax.f32 %v276_v57, 0.0  ;;  %v789_v61 = vmax.f32 %v277_v58, 0.0  ;;  %v278_v62 = vld [vmem:[#allocation2 + $0x7f8] sm:$0xff]  ;;  %v279_v63 = vld [vmem:[#allocation2 + $0x800] sm:$0xff] }
  0x8e   :  { %v280_v0 = vld [vmem:[#allocation2 + $0x808] sm:$0xff]  ;;  %1296 = vst [vmem:[#allocation5 + $0x7c8] sm:$0xff] %v784_v53  ;;  %1297 = vst [vmem:[#allocation5 + $0x7d0] sm:$0xff] %v785_v54  ;;  %v790_v1 = vmax.f32 %v278_v62, 0.0  ;;  %v791_v2 = vmax.f32 %v279_v63, 0.0  ;;  %v281_v4 = vld [vmem:[#allocation2 + $0x810] sm:$0xff] }
  0x8f   :  { %1298 = vst [vmem:[#allocation5 + $0x7d8] sm:$0xff] %v786_v55  ;;  %v792_v3 = vmax.f32 %v280_v0, 0.0  ;;  %v282_v5 = vld [vmem:[#allocation2 + $0x818] sm:$0xff]  ;;  %v283_v6 = vld [vmem:[#allocation2 + $0x820] sm:$0xff]  ;;  %1299 = vst [vmem:[#allocation5 + $0x7e0] sm:$0xff] %v787_v59  ;;  %v793_v7 = vmax.f32 %v281_v4, 0.0 }
  0x90   :  { %1300 = vst [vmem:[#allocation5 + $0x7e8] sm:$0xff] %v788_v60  ;;  %1301 = vst [vmem:[#allocation5 + $0x7f0] sm:$0xff] %v789_v61  ;;  %v794_v8 = vmax.f32 %v282_v5, 0.0  ;;  %v795_v9 = vmax.f32 %v283_v6, 0.0  ;;  %v284_v10 = vld [vmem:[#allocation2 + $0x828] sm:$0xff]  ;;  %v285_v11 = vld [vmem:[#allocation2 + $0x830] sm:$0xff] }
  0x91   :  { %v286_v12 = vld [vmem:[#allocation2 + $0x838] sm:$0xff]  ;;  %1302 = vst [vmem:[#allocation5 + $0x7f8] sm:$0xff] %v790_v1  ;;  %1303 = vst [vmem:[#allocation5 + $0x800] sm:$0xff] %v791_v2  ;;  %v796_v13 = vmax.f32 %v284_v10, 0.0  ;;  %v797_v14 = vmax.f32 %v285_v11, 0.0  ;;  %v287_v16 = vld [vmem:[#allocation2 + $0x840] sm:$0xff] }
  0x92   :  { %1304 = vst [vmem:[#allocation5 + $0x808] sm:$0xff] %v792_v3  ;;  %v798_v15 = vmax.f32 %v286_v12, 0.0  ;;  %v288_v17 = vld [vmem:[#allocation2 + $0x848] sm:$0xff]  ;;  %v289_v18 = vld [vmem:[#allocation2 + $0x850] sm:$0xff]  ;;  %1305 = vst [vmem:[#allocation5 + $0x810] sm:$0xff] %v793_v7  ;;  %v799_v19 = vmax.f32 %v287_v16, 0.0 }
  0x93   :  { %1306 = vst [vmem:[#allocation5 + $0x818] sm:$0xff] %v794_v8  ;;  %1307 = vst [vmem:[#allocation5 + $0x820] sm:$0xff] %v795_v9  ;;  %v800_v20 = vmax.f32 %v288_v17, 0.0  ;;  %v801_v21 = vmax.f32 %v289_v18, 0.0  ;;  %v290_v22 = vld [vmem:[#allocation2 + $0x858] sm:$0xff]  ;;  %v291_v23 = vld [vmem:[#allocation2 + $0x860] sm:$0xff] }
  0x94   :  { %v292_v24 = vld [vmem:[#allocation2 + $0x868] sm:$0xff]  ;;  %1308 = vst [vmem:[#allocation5 + $0x828] sm:$0xff] %v796_v13  ;;  %1309 = vst [vmem:[#allocation5 + $0x830] sm:$0xff] %v797_v14  ;;  %v802_v25 = vmax.f32 %v290_v22, 0.0  ;;  %v803_v26 = vmax.f32 %v291_v23, 0.0  ;;  %v293_v28 = vld [vmem:[#allocation2 + $0x870] sm:$0xff] }
  0x95   :  { %1310 = vst [vmem:[#allocation5 + $0x838] sm:$0xff] %v798_v15  ;;  %v804_v27 = vmax.f32 %v292_v24, 0.0  ;;  %v294_v29 = vld [vmem:[#allocation2 + $0x878] sm:$0xff]  ;;  %v295_v30 = vld [vmem:[#allocation2 + $0x880] sm:$0xff]  ;;  %1311 = vst [vmem:[#allocation5 + $0x840] sm:$0xff] %v799_v19  ;;  %v805_v31 = vmax.f32 %v293_v28, 0.0 }
  0x96   :  { %1312 = vst [vmem:[#allocation5 + $0x848] sm:$0xff] %v800_v20  ;;  %1313 = vst [vmem:[#allocation5 + $0x850] sm:$0xff] %v801_v21  ;;  %v806_v32 = vmax.f32 %v294_v29, 0.0  ;;  %v807_v33 = vmax.f32 %v295_v30, 0.0  ;;  %v296_v34 = vld [vmem:[#allocation2 + $0x888] sm:$0xff]  ;;  %v297_v35 = vld [vmem:[#allocation2 + $0x890] sm:$0xff] }
  0x97   :  { %v298_v36 = vld [vmem:[#allocation2 + $0x898] sm:$0xff]  ;;  %1314 = vst [vmem:[#allocation5 + $0x858] sm:$0xff] %v802_v25  ;;  %1315 = vst [vmem:[#allocation5 + $0x860] sm:$0xff] %v803_v26  ;;  %v808_v37 = vmax.f32 %v296_v34, 0.0  ;;  %v809_v38 = vmax.f32 %v297_v35, 0.0  ;;  %v299_v40 = vld [vmem:[#allocation2 + $0x8a0] sm:$0xff] }
  0x98   :  { %1316 = vst [vmem:[#allocation5 + $0x868] sm:$0xff] %v804_v27  ;;  %v810_v39 = vmax.f32 %v298_v36, 0.0  ;;  %v300_v41 = vld [vmem:[#allocation2 + $0x8a8] sm:$0xff]  ;;  %v301_v42 = vld [vmem:[#allocation2 + $0x8b0] sm:$0xff]  ;;  %1317 = vst [vmem:[#allocation5 + $0x870] sm:$0xff] %v805_v31  ;;  %v811_v43 = vmax.f32 %v299_v40, 0.0 }
  0x99   :  { %1318 = vst [vmem:[#allocation5 + $0x878] sm:$0xff] %v806_v32  ;;  %1319 = vst [vmem:[#allocation5 + $0x880] sm:$0xff] %v807_v33  ;;  %v812_v44 = vmax.f32 %v300_v41, 0.0  ;;  %v813_v45 = vmax.f32 %v301_v42, 0.0  ;;  %v302_v46 = vld [vmem:[#allocation2 + $0x8b8] sm:$0xff]  ;;  %v303_v47 = vld [vmem:[#allocation2 + $0x8c0] sm:$0xff] }
  0x9a   :  { %v304_v48 = vld [vmem:[#allocation2 + $0x8c8] sm:$0xff]  ;;  %1320 = vst [vmem:[#allocation5 + $0x888] sm:$0xff] %v808_v37  ;;  %1321 = vst [vmem:[#allocation5 + $0x890] sm:$0xff] %v809_v38  ;;  %v814_v49 = vmax.f32 %v302_v46, 0.0  ;;  %v815_v50 = vmax.f32 %v303_v47, 0.0  ;;  %v305_v52 = vld [vmem:[#allocation2 + $0x8d0] sm:$0xff] }
  0x9b   :  { %1322 = vst [vmem:[#allocation5 + $0x898] sm:$0xff] %v810_v39  ;;  %v816_v51 = vmax.f32 %v304_v48, 0.0  ;;  %v306_v53 = vld [vmem:[#allocation2 + $0x8d8] sm:$0xff]  ;;  %v307_v54 = vld [vmem:[#allocation2 + $0x8e0] sm:$0xff]  ;;  %1323 = vst [vmem:[#allocation5 + $0x8a0] sm:$0xff] %v811_v43  ;;  %v817_v55 = vmax.f32 %v305_v52, 0.0 }
  0x9c   :  { %1324 = vst [vmem:[#allocation5 + $0x8a8] sm:$0xff] %v812_v44  ;;  %1325 = vst [vmem:[#allocation5 + $0x8b0] sm:$0xff] %v813_v45  ;;  %v818_v56 = vmax.f32 %v306_v53, 0.0  ;;  %v819_v57 = vmax.f32 %v307_v54, 0.0  ;;  %v308_v58 = vld [vmem:[#allocation2 + $0x8e8] sm:$0xff]  ;;  %v309_v59 = vld [vmem:[#allocation2 + $0x8f0] sm:$0xff] }
  0x9d   :  { %v310_v60 = vld [vmem:[#allocation2 + $0x8f8] sm:$0xff]  ;;  %1326 = vst [vmem:[#allocation5 + $0x8b8] sm:$0xff] %v814_v49  ;;  %1327 = vst [vmem:[#allocation5 + $0x8c0] sm:$0xff] %v815_v50  ;;  %v820_v61 = vmax.f32 %v308_v58, 0.0  ;;  %v821_v62 = vmax.f32 %v309_v59, 0.0  ;;  %v311_v0 = vld [vmem:[#allocation2 + $0x900] sm:$0xff] }
  0x9e   :  { %1328 = vst [vmem:[#allocation5 + $0x8c8] sm:$0xff] %v816_v51  ;;  %v822_v63 = vmax.f32 %v310_v60, 0.0  ;;  %v312_v1 = vld [vmem:[#allocation2 + $0x908] sm:$0xff]  ;;  %v313_v2 = vld [vmem:[#allocation2 + $0x910] sm:$0xff]  ;;  %1329 = vst [vmem:[#allocation5 + $0x8d0] sm:$0xff] %v817_v55  ;;  %v823_v3 = vmax.f32 %v311_v0, 0.0 }
  0x9f   :  { %1330 = vst [vmem:[#allocation5 + $0x8d8] sm:$0xff] %v818_v56  ;;  %1331 = vst [vmem:[#allocation5 + $0x8e0] sm:$0xff] %v819_v57  ;;  %v824_v4 = vmax.f32 %v312_v1, 0.0  ;;  %v825_v5 = vmax.f32 %v313_v2, 0.0  ;;  %v314_v6 = vld [vmem:[#allocation2 + $0x918] sm:$0xff]  ;;  %v315_v7 = vld [vmem:[#allocation2 + $0x920] sm:$0xff] }
  0xa0   :  { %v316_v8 = vld [vmem:[#allocation2 + $0x928] sm:$0xff]  ;;  %1332 = vst [vmem:[#allocation5 + $0x8e8] sm:$0xff] %v820_v61  ;;  %1333 = vst [vmem:[#allocation5 + $0x8f0] sm:$0xff] %v821_v62  ;;  %v826_v9 = vmax.f32 %v314_v6, 0.0  ;;  %v827_v10 = vmax.f32 %v315_v7, 0.0  ;;  %v317_v12 = vld [vmem:[#allocation2 + $0x930] sm:$0xff] }
  0xa1   :  { %1334 = vst [vmem:[#allocation5 + $0x8f8] sm:$0xff] %v822_v63  ;;  %v828_v11 = vmax.f32 %v316_v8, 0.0  ;;  %v318_v13 = vld [vmem:[#allocation2 + $0x938] sm:$0xff]  ;;  %v319_v14 = vld [vmem:[#allocation2 + $0x940] sm:$0xff]  ;;  %1335 = vst [vmem:[#allocation5 + $0x900] sm:$0xff] %v823_v3  ;;  %v829_v15 = vmax.f32 %v317_v12, 0.0 }
  0xa2   :  { %1336 = vst [vmem:[#allocation5 + $0x908] sm:$0xff] %v824_v4  ;;  %1337 = vst [vmem:[#allocation5 + $0x910] sm:$0xff] %v825_v5  ;;  %v830_v16 = vmax.f32 %v318_v13, 0.0  ;;  %v831_v17 = vmax.f32 %v319_v14, 0.0  ;;  %v320_v18 = vld [vmem:[#allocation2 + $0x948] sm:$0xff]  ;;  %v321_v19 = vld [vmem:[#allocation2 + $0x950] sm:$0xff] }
  0xa3   :  { %v322_v20 = vld [vmem:[#allocation2 + $0x958] sm:$0xff]  ;;  %1338 = vst [vmem:[#allocation5 + $0x918] sm:$0xff] %v826_v9  ;;  %1339 = vst [vmem:[#allocation5 + $0x920] sm:$0xff] %v827_v10  ;;  %v832_v21 = vmax.f32 %v320_v18, 0.0  ;;  %v833_v22 = vmax.f32 %v321_v19, 0.0  ;;  %v323_v24 = vld [vmem:[#allocation2 + $0x960] sm:$0xff] }
  0xa4   :  { %1340 = vst [vmem:[#allocation5 + $0x928] sm:$0xff] %v828_v11  ;;  %v834_v23 = vmax.f32 %v322_v20, 0.0  ;;  %v324_v25 = vld [vmem:[#allocation2 + $0x968] sm:$0xff]  ;;  %v325_v26 = vld [vmem:[#allocation2 + $0x970] sm:$0xff]  ;;  %1341 = vst [vmem:[#allocation5 + $0x930] sm:$0xff] %v829_v15  ;;  %v835_v27 = vmax.f32 %v323_v24, 0.0 }
  0xa5   :  { %1342 = vst [vmem:[#allocation5 + $0x938] sm:$0xff] %v830_v16  ;;  %1343 = vst [vmem:[#allocation5 + $0x940] sm:$0xff] %v831_v17  ;;  %v836_v28 = vmax.f32 %v324_v25, 0.0  ;;  %v837_v29 = vmax.f32 %v325_v26, 0.0  ;;  %v326_v30 = vld [vmem:[#allocation2 + $0x978] sm:$0xff]  ;;  %v327_v31 = vld [vmem:[#allocation2 + $0x980] sm:$0xff] }
  0xa6   :  { %v328_v32 = vld [vmem:[#allocation2 + $0x988] sm:$0xff]  ;;  %1344 = vst [vmem:[#allocation5 + $0x948] sm:$0xff] %v832_v21  ;;  %1345 = vst [vmem:[#allocation5 + $0x950] sm:$0xff] %v833_v22  ;;  %v838_v33 = vmax.f32 %v326_v30, 0.0  ;;  %v839_v34 = vmax.f32 %v327_v31, 0.0  ;;  %v329_v36 = vld [vmem:[#allocation2 + $0x990] sm:$0xff] }
  0xa7   :  { %1346 = vst [vmem:[#allocation5 + $0x958] sm:$0xff] %v834_v23  ;;  %v840_v35 = vmax.f32 %v328_v32, 0.0  ;;  %v330_v37 = vld [vmem:[#allocation2 + $0x998] sm:$0xff]  ;;  %v331_v38 = vld [vmem:[#allocation2 + $0x9a0] sm:$0xff]  ;;  %1347 = vst [vmem:[#allocation5 + $0x960] sm:$0xff] %v835_v27  ;;  %v841_v39 = vmax.f32 %v329_v36, 0.0 }
  0xa8   :  { %1348 = vst [vmem:[#allocation5 + $0x968] sm:$0xff] %v836_v28  ;;  %1349 = vst [vmem:[#allocation5 + $0x970] sm:$0xff] %v837_v29  ;;  %v842_v40 = vmax.f32 %v330_v37, 0.0  ;;  %v843_v41 = vmax.f32 %v331_v38, 0.0  ;;  %v332_v42 = vld [vmem:[#allocation2 + $0x9a8] sm:$0xff]  ;;  %v333_v43 = vld [vmem:[#allocation2 + $0x9b0] sm:$0xff] }
  0xa9   :  { %v334_v44 = vld [vmem:[#allocation2 + $0x9b8] sm:$0xff]  ;;  %1350 = vst [vmem:[#allocation5 + $0x978] sm:$0xff] %v838_v33  ;;  %1351 = vst [vmem:[#allocation5 + $0x980] sm:$0xff] %v839_v34  ;;  %v844_v45 = vmax.f32 %v332_v42, 0.0  ;;  %v845_v46 = vmax.f32 %v333_v43, 0.0  ;;  %v335_v48 = vld [vmem:[#allocation2 + $0x9c0] sm:$0xff] }
  0xaa   :  { %1352 = vst [vmem:[#allocation5 + $0x988] sm:$0xff] %v840_v35  ;;  %v846_v47 = vmax.f32 %v334_v44, 0.0  ;;  %v336_v49 = vld [vmem:[#allocation2 + $0x9c8] sm:$0xff]  ;;  %v337_v50 = vld [vmem:[#allocation2 + $0x9d0] sm:$0xff]  ;;  %1353 = vst [vmem:[#allocation5 + $0x990] sm:$0xff] %v841_v39  ;;  %v847_v51 = vmax.f32 %v335_v48, 0.0 }
  0xab   :  { %1354 = vst [vmem:[#allocation5 + $0x998] sm:$0xff] %v842_v40  ;;  %1355 = vst [vmem:[#allocation5 + $0x9a0] sm:$0xff] %v843_v41  ;;  %v848_v52 = vmax.f32 %v336_v49, 0.0  ;;  %v849_v53 = vmax.f32 %v337_v50, 0.0  ;;  %v338_v54 = vld [vmem:[#allocation2 + $0x9d8] sm:$0xff]  ;;  %v339_v55 = vld [vmem:[#allocation2 + $0x9e0] sm:$0xff] }
  0xac   :  { %v340_v56 = vld [vmem:[#allocation2 + $0x9e8] sm:$0xff]  ;;  %1356 = vst [vmem:[#allocation5 + $0x9a8] sm:$0xff] %v844_v45  ;;  %1357 = vst [vmem:[#allocation5 + $0x9b0] sm:$0xff] %v845_v46  ;;  %v850_v57 = vmax.f32 %v338_v54, 0.0  ;;  %v851_v58 = vmax.f32 %v339_v55, 0.0  ;;  %v341_v60 = vld [vmem:[#allocation2 + $0x9f0] sm:$0xff] }
  0xad   :  { %1358 = vst [vmem:[#allocation5 + $0x9b8] sm:$0xff] %v846_v47  ;;  %v852_v59 = vmax.f32 %v340_v56, 0.0  ;;  %v342_v61 = vld [vmem:[#allocation2 + $0x9f8] sm:$0xff]  ;;  %v343_v62 = vld [vmem:[#allocation2 + $0xa00] sm:$0xff]  ;;  %1359 = vst [vmem:[#allocation5 + $0x9c0] sm:$0xff] %v847_v51  ;;  %v853_v63 = vmax.f32 %v341_v60, 0.0 }
  0xae   :  { %1360 = vst [vmem:[#allocation5 + $0x9c8] sm:$0xff] %v848_v52  ;;  %1361 = vst [vmem:[#allocation5 + $0x9d0] sm:$0xff] %v849_v53  ;;  %v854_v0 = vmax.f32 %v342_v61, 0.0  ;;  %v855_v1 = vmax.f32 %v343_v62, 0.0  ;;  %v344_v2 = vld [vmem:[#allocation2 + $0xa08] sm:$0xff]  ;;  %v345_v3 = vld [vmem:[#allocation2 + $0xa10] sm:$0xff] }
  0xaf   :  { %v346_v4 = vld [vmem:[#allocation2 + $0xa18] sm:$0xff]  ;;  %1362 = vst [vmem:[#allocation5 + $0x9d8] sm:$0xff] %v850_v57  ;;  %1363 = vst [vmem:[#allocation5 + $0x9e0] sm:$0xff] %v851_v58  ;;  %v856_v5 = vmax.f32 %v344_v2, 0.0  ;;  %v857_v6 = vmax.f32 %v345_v3, 0.0  ;;  %v347_v8 = vld [vmem:[#allocation2 + $0xa20] sm:$0xff] }
  0xb0   :  { %1364 = vst [vmem:[#allocation5 + $0x9e8] sm:$0xff] %v852_v59  ;;  %v858_v7 = vmax.f32 %v346_v4, 0.0  ;;  %v348_v9 = vld [vmem:[#allocation2 + $0xa28] sm:$0xff]  ;;  %v349_v10 = vld [vmem:[#allocation2 + $0xa30] sm:$0xff]  ;;  %1365 = vst [vmem:[#allocation5 + $0x9f0] sm:$0xff] %v853_v63  ;;  %v859_v11 = vmax.f32 %v347_v8, 0.0 }
  0xb1   :  { %1366 = vst [vmem:[#allocation5 + $0x9f8] sm:$0xff] %v854_v0  ;;  %1367 = vst [vmem:[#allocation5 + $0xa00] sm:$0xff] %v855_v1  ;;  %v860_v12 = vmax.f32 %v348_v9, 0.0  ;;  %v861_v13 = vmax.f32 %v349_v10, 0.0  ;;  %v350_v14 = vld [vmem:[#allocation2 + $0xa38] sm:$0xff]  ;;  %v351_v15 = vld [vmem:[#allocation2 + $0xa40] sm:$0xff] }
  0xb2   :  { %v352_v16 = vld [vmem:[#allocation2 + $0xa48] sm:$0xff]  ;;  %1368 = vst [vmem:[#allocation5 + $0xa08] sm:$0xff] %v856_v5  ;;  %1369 = vst [vmem:[#allocation5 + $0xa10] sm:$0xff] %v857_v6  ;;  %v862_v17 = vmax.f32 %v350_v14, 0.0  ;;  %v863_v18 = vmax.f32 %v351_v15, 0.0  ;;  %v353_v20 = vld [vmem:[#allocation2 + $0xa50] sm:$0xff] }
  0xb3   :  { %1370 = vst [vmem:[#allocation5 + $0xa18] sm:$0xff] %v858_v7  ;;  %v864_v19 = vmax.f32 %v352_v16, 0.0  ;;  %v354_v21 = vld [vmem:[#allocation2 + $0xa58] sm:$0xff]  ;;  %v355_v22 = vld [vmem:[#allocation2 + $0xa60] sm:$0xff]  ;;  %1371 = vst [vmem:[#allocation5 + $0xa20] sm:$0xff] %v859_v11  ;;  %v865_v23 = vmax.f32 %v353_v20, 0.0 }
  0xb4   :  { %1372 = vst [vmem:[#allocation5 + $0xa28] sm:$0xff] %v860_v12  ;;  %1373 = vst [vmem:[#allocation5 + $0xa30] sm:$0xff] %v861_v13  ;;  %v866_v24 = vmax.f32 %v354_v21, 0.0  ;;  %v867_v25 = vmax.f32 %v355_v22, 0.0  ;;  %v356_v26 = vld [vmem:[#allocation2 + $0xa68] sm:$0xff]  ;;  %v357_v27 = vld [vmem:[#allocation2 + $0xa70] sm:$0xff] }
  0xb5   :  { %v358_v28 = vld [vmem:[#allocation2 + $0xa78] sm:$0xff]  ;;  %1374 = vst [vmem:[#allocation5 + $0xa38] sm:$0xff] %v862_v17  ;;  %1375 = vst [vmem:[#allocation5 + $0xa40] sm:$0xff] %v863_v18  ;;  %v868_v29 = vmax.f32 %v356_v26, 0.0  ;;  %v869_v30 = vmax.f32 %v357_v27, 0.0  ;;  %v359_v32 = vld [vmem:[#allocation2 + $0xa80] sm:$0xff] }
  0xb6   :  { %1376 = vst [vmem:[#allocation5 + $0xa48] sm:$0xff] %v864_v19  ;;  %v870_v31 = vmax.f32 %v358_v28, 0.0  ;;  %v360_v33 = vld [vmem:[#allocation2 + $0xa88] sm:$0xff]  ;;  %v361_v34 = vld [vmem:[#allocation2 + $0xa90] sm:$0xff]  ;;  %1377 = vst [vmem:[#allocation5 + $0xa50] sm:$0xff] %v865_v23  ;;  %v871_v35 = vmax.f32 %v359_v32, 0.0 }
  0xb7   :  { %1378 = vst [vmem:[#allocation5 + $0xa58] sm:$0xff] %v866_v24  ;;  %1379 = vst [vmem:[#allocation5 + $0xa60] sm:$0xff] %v867_v25  ;;  %v872_v36 = vmax.f32 %v360_v33, 0.0  ;;  %v873_v37 = vmax.f32 %v361_v34, 0.0  ;;  %v362_v38 = vld [vmem:[#allocation2 + $0xa98] sm:$0xff]  ;;  %v363_v39 = vld [vmem:[#allocation2 + $0xaa0] sm:$0xff] }
  0xb8   :  { %v364_v40 = vld [vmem:[#allocation2 + $0xaa8] sm:$0xff]  ;;  %1380 = vst [vmem:[#allocation5 + $0xa68] sm:$0xff] %v868_v29  ;;  %1381 = vst [vmem:[#allocation5 + $0xa70] sm:$0xff] %v869_v30  ;;  %v874_v41 = vmax.f32 %v362_v38, 0.0  ;;  %v875_v42 = vmax.f32 %v363_v39, 0.0  ;;  %v365_v44 = vld [vmem:[#allocation2 + $0xab0] sm:$0xff] }
  0xb9   :  { %1382 = vst [vmem:[#allocation5 + $0xa78] sm:$0xff] %v870_v31  ;;  %v876_v43 = vmax.f32 %v364_v40, 0.0  ;;  %v366_v45 = vld [vmem:[#allocation2 + $0xab8] sm:$0xff]  ;;  %v367_v46 = vld [vmem:[#allocation2 + $0xac0] sm:$0xff]  ;;  %1383 = vst [vmem:[#allocation5 + $0xa80] sm:$0xff] %v871_v35  ;;  %v877_v47 = vmax.f32 %v365_v44, 0.0 }
  0xba   :  { %1384 = vst [vmem:[#allocation5 + $0xa88] sm:$0xff] %v872_v36  ;;  %1385 = vst [vmem:[#allocation5 + $0xa90] sm:$0xff] %v873_v37  ;;  %v878_v48 = vmax.f32 %v366_v45, 0.0  ;;  %v879_v49 = vmax.f32 %v367_v46, 0.0  ;;  %v368_v50 = vld [vmem:[#allocation2 + $0xac8] sm:$0xff]  ;;  %v369_v51 = vld [vmem:[#allocation2 + $0xad0] sm:$0xff] }
  0xbb   :  { %v370_v52 = vld [vmem:[#allocation2 + $0xad8] sm:$0xff]  ;;  %1386 = vst [vmem:[#allocation5 + $0xa98] sm:$0xff] %v874_v41  ;;  %1387 = vst [vmem:[#allocation5 + $0xaa0] sm:$0xff] %v875_v42  ;;  %v880_v53 = vmax.f32 %v368_v50, 0.0  ;;  %v881_v54 = vmax.f32 %v369_v51, 0.0  ;;  %v371_v56 = vld [vmem:[#allocation2 + $0xae0] sm:$0xff] }
  0xbc   :  { %1388 = vst [vmem:[#allocation5 + $0xaa8] sm:$0xff] %v876_v43  ;;  %v882_v55 = vmax.f32 %v370_v52, 0.0  ;;  %v372_v57 = vld [vmem:[#allocation2 + $0xae8] sm:$0xff]  ;;  %v373_v58 = vld [vmem:[#allocation2 + $0xaf0] sm:$0xff]  ;;  %1389 = vst [vmem:[#allocation5 + $0xab0] sm:$0xff] %v877_v47  ;;  %v883_v59 = vmax.f32 %v371_v56, 0.0 }
  0xbd   :  { %1390 = vst [vmem:[#allocation5 + $0xab8] sm:$0xff] %v878_v48  ;;  %1391 = vst [vmem:[#allocation5 + $0xac0] sm:$0xff] %v879_v49  ;;  %v884_v60 = vmax.f32 %v372_v57, 0.0  ;;  %v885_v61 = vmax.f32 %v373_v58, 0.0  ;;  %v374_v62 = vld [vmem:[#allocation2 + $0xaf8] sm:$0xff]  ;;  %v375_v63 = vld [vmem:[#allocation2 + $0xb00] sm:$0xff] }
  0xbe   :  { %v376_v0 = vld [vmem:[#allocation2 + $0xb08] sm:$0xff]  ;;  %1392 = vst [vmem:[#allocation5 + $0xac8] sm:$0xff] %v880_v53  ;;  %1393 = vst [vmem:[#allocation5 + $0xad0] sm:$0xff] %v881_v54  ;;  %v886_v1 = vmax.f32 %v374_v62, 0.0  ;;  %v887_v2 = vmax.f32 %v375_v63, 0.0  ;;  %v377_v4 = vld [vmem:[#allocation2 + $0xb10] sm:$0xff] }
  0xbf   :  { %1394 = vst [vmem:[#allocation5 + $0xad8] sm:$0xff] %v882_v55  ;;  %v888_v3 = vmax.f32 %v376_v0, 0.0  ;;  %v378_v5 = vld [vmem:[#allocation2 + $0xb18] sm:$0xff]  ;;  %v379_v6 = vld [vmem:[#allocation2 + $0xb20] sm:$0xff]  ;;  %1395 = vst [vmem:[#allocation5 + $0xae0] sm:$0xff] %v883_v59  ;;  %v889_v7 = vmax.f32 %v377_v4, 0.0 }
  0xc0   :  { %1396 = vst [vmem:[#allocation5 + $0xae8] sm:$0xff] %v884_v60  ;;  %1397 = vst [vmem:[#allocation5 + $0xaf0] sm:$0xff] %v885_v61  ;;  %v890_v8 = vmax.f32 %v378_v5, 0.0  ;;  %v891_v9 = vmax.f32 %v379_v6, 0.0  ;;  %v380_v10 = vld [vmem:[#allocation2 + $0xb28] sm:$0xff]  ;;  %v381_v11 = vld [vmem:[#allocation2 + $0xb30] sm:$0xff] }
  0xc1   :  { %v382_v12 = vld [vmem:[#allocation2 + $0xb38] sm:$0xff]  ;;  %1398 = vst [vmem:[#allocation5 + $0xaf8] sm:$0xff] %v886_v1  ;;  %1399 = vst [vmem:[#allocation5 + $0xb00] sm:$0xff] %v887_v2  ;;  %v892_v13 = vmax.f32 %v380_v10, 0.0  ;;  %v893_v14 = vmax.f32 %v381_v11, 0.0  ;;  %v383_v16 = vld [vmem:[#allocation2 + $0xb40] sm:$0xff] }
  0xc2   :  { %1400 = vst [vmem:[#allocation5 + $0xb08] sm:$0xff] %v888_v3  ;;  %v894_v15 = vmax.f32 %v382_v12, 0.0  ;;  %v384_v17 = vld [vmem:[#allocation2 + $0xb48] sm:$0xff]  ;;  %v385_v18 = vld [vmem:[#allocation2 + $0xb50] sm:$0xff]  ;;  %1401 = vst [vmem:[#allocation5 + $0xb10] sm:$0xff] %v889_v7  ;;  %v895_v19 = vmax.f32 %v383_v16, 0.0 }
  0xc3   :  { %1402 = vst [vmem:[#allocation5 + $0xb18] sm:$0xff] %v890_v8  ;;  %1403 = vst [vmem:[#allocation5 + $0xb20] sm:$0xff] %v891_v9  ;;  %v896_v20 = vmax.f32 %v384_v17, 0.0  ;;  %v897_v21 = vmax.f32 %v385_v18, 0.0  ;;  %v386_v22 = vld [vmem:[#allocation2 + $0xb58] sm:$0xff]  ;;  %v387_v23 = vld [vmem:[#allocation2 + $0xb60] sm:$0xff] }
  0xc4   :  { %v388_v24 = vld [vmem:[#allocation2 + $0xb68] sm:$0xff]  ;;  %1404 = vst [vmem:[#allocation5 + $0xb28] sm:$0xff] %v892_v13  ;;  %1405 = vst [vmem:[#allocation5 + $0xb30] sm:$0xff] %v893_v14  ;;  %v898_v25 = vmax.f32 %v386_v22, 0.0  ;;  %v899_v26 = vmax.f32 %v387_v23, 0.0  ;;  %v389_v28 = vld [vmem:[#allocation2 + $0xb70] sm:$0xff] }
  0xc5   :  { %1406 = vst [vmem:[#allocation5 + $0xb38] sm:$0xff] %v894_v15  ;;  %v900_v27 = vmax.f32 %v388_v24, 0.0  ;;  %v390_v29 = vld [vmem:[#allocation2 + $0xb78] sm:$0xff]  ;;  %v391_v30 = vld [vmem:[#allocation2 + $0xb80] sm:$0xff]  ;;  %1407 = vst [vmem:[#allocation5 + $0xb40] sm:$0xff] %v895_v19  ;;  %v901_v31 = vmax.f32 %v389_v28, 0.0 }
  0xc6   :  { %1408 = vst [vmem:[#allocation5 + $0xb48] sm:$0xff] %v896_v20  ;;  %1409 = vst [vmem:[#allocation5 + $0xb50] sm:$0xff] %v897_v21  ;;  %v902_v32 = vmax.f32 %v390_v29, 0.0  ;;  %v903_v33 = vmax.f32 %v391_v30, 0.0  ;;  %v392_v34 = vld [vmem:[#allocation2 + $0xb88] sm:$0xff]  ;;  %v393_v35 = vld [vmem:[#allocation2 + $0xb90] sm:$0xff] }
  0xc7   :  { %v394_v36 = vld [vmem:[#allocation2 + $0xb98] sm:$0xff]  ;;  %1410 = vst [vmem:[#allocation5 + $0xb58] sm:$0xff] %v898_v25  ;;  %1411 = vst [vmem:[#allocation5 + $0xb60] sm:$0xff] %v899_v26  ;;  %v904_v37 = vmax.f32 %v392_v34, 0.0  ;;  %v905_v38 = vmax.f32 %v393_v35, 0.0  ;;  %v395_v40 = vld [vmem:[#allocation2 + $0xba0] sm:$0xff] }
  0xc8   :  { %1412 = vst [vmem:[#allocation5 + $0xb68] sm:$0xff] %v900_v27  ;;  %v906_v39 = vmax.f32 %v394_v36, 0.0  ;;  %v396_v41 = vld [vmem:[#allocation2 + $0xba8] sm:$0xff]  ;;  %v397_v42 = vld [vmem:[#allocation2 + $0xbb0] sm:$0xff]  ;;  %1413 = vst [vmem:[#allocation5 + $0xb70] sm:$0xff] %v901_v31  ;;  %v907_v43 = vmax.f32 %v395_v40, 0.0 }
  0xc9   :  { %1414 = vst [vmem:[#allocation5 + $0xb78] sm:$0xff] %v902_v32  ;;  %1415 = vst [vmem:[#allocation5 + $0xb80] sm:$0xff] %v903_v33  ;;  %v908_v44 = vmax.f32 %v396_v41, 0.0  ;;  %v909_v45 = vmax.f32 %v397_v42, 0.0  ;;  %v398_v46 = vld [vmem:[#allocation2 + $0xbb8] sm:$0xff]  ;;  %v399_v47 = vld [vmem:[#allocation2 + $0xbc0] sm:$0xff] }
  0xca   :  { %v400_v48 = vld [vmem:[#allocation2 + $0xbc8] sm:$0xff]  ;;  %1416 = vst [vmem:[#allocation5 + $0xb88] sm:$0xff] %v904_v37  ;;  %1417 = vst [vmem:[#allocation5 + $0xb90] sm:$0xff] %v905_v38  ;;  %v910_v49 = vmax.f32 %v398_v46, 0.0  ;;  %v911_v50 = vmax.f32 %v399_v47, 0.0  ;;  %v401_v52 = vld [vmem:[#allocation2 + $0xbd0] sm:$0xff] }
  0xcb   :  { %1418 = vst [vmem:[#allocation5 + $0xb98] sm:$0xff] %v906_v39  ;;  %v912_v51 = vmax.f32 %v400_v48, 0.0  ;;  %v402_v53 = vld [vmem:[#allocation2 + $0xbd8] sm:$0xff]  ;;  %v403_v54 = vld [vmem:[#allocation2 + $0xbe0] sm:$0xff]  ;;  %1419 = vst [vmem:[#allocation5 + $0xba0] sm:$0xff] %v907_v43  ;;  %v913_v55 = vmax.f32 %v401_v52, 0.0 }
  0xcc   :  { %1420 = vst [vmem:[#allocation5 + $0xba8] sm:$0xff] %v908_v44  ;;  %1421 = vst [vmem:[#allocation5 + $0xbb0] sm:$0xff] %v909_v45  ;;  %v914_v56 = vmax.f32 %v402_v53, 0.0  ;;  %v915_v57 = vmax.f32 %v403_v54, 0.0  ;;  %v404_v58 = vld [vmem:[#allocation2 + $0xbe8] sm:$0xff]  ;;  %v405_v59 = vld [vmem:[#allocation2 + $0xbf0] sm:$0xff] }
  0xcd   :  { %v406_v60 = vld [vmem:[#allocation2 + $0xbf8] sm:$0xff]  ;;  %1422 = vst [vmem:[#allocation5 + $0xbb8] sm:$0xff] %v910_v49  ;;  %1423 = vst [vmem:[#allocation5 + $0xbc0] sm:$0xff] %v911_v50  ;;  %v916_v61 = vmax.f32 %v404_v58, 0.0  ;;  %v917_v62 = vmax.f32 %v405_v59, 0.0  ;;  %v407_v0 = vld [vmem:[#allocation2 + $0xc00] sm:$0xff] }
  0xce   :  { %1424 = vst [vmem:[#allocation5 + $0xbc8] sm:$0xff] %v912_v51  ;;  %v918_v63 = vmax.f32 %v406_v60, 0.0  ;;  %v408_v1 = vld [vmem:[#allocation2 + $0xc08] sm:$0xff]  ;;  %v409_v2 = vld [vmem:[#allocation2 + $0xc10] sm:$0xff]  ;;  %1425 = vst [vmem:[#allocation5 + $0xbd0] sm:$0xff] %v913_v55  ;;  %v919_v3 = vmax.f32 %v407_v0, 0.0 }
  0xcf   :  { %1426 = vst [vmem:[#allocation5 + $0xbd8] sm:$0xff] %v914_v56  ;;  %1427 = vst [vmem:[#allocation5 + $0xbe0] sm:$0xff] %v915_v57  ;;  %v920_v4 = vmax.f32 %v408_v1, 0.0  ;;  %v921_v5 = vmax.f32 %v409_v2, 0.0  ;;  %v410_v6 = vld [vmem:[#allocation2 + $0xc18] sm:$0xff]  ;;  %v411_v7 = vld [vmem:[#allocation2 + $0xc20] sm:$0xff] }
  0xd0   :  { %v412_v8 = vld [vmem:[#allocation2 + $0xc28] sm:$0xff]  ;;  %1428 = vst [vmem:[#allocation5 + $0xbe8] sm:$0xff] %v916_v61  ;;  %1429 = vst [vmem:[#allocation5 + $0xbf0] sm:$0xff] %v917_v62  ;;  %v922_v9 = vmax.f32 %v410_v6, 0.0  ;;  %v923_v10 = vmax.f32 %v411_v7, 0.0  ;;  %v413_v12 = vld [vmem:[#allocation2 + $0xc30] sm:$0xff] }
  0xd1   :  { %1430 = vst [vmem:[#allocation5 + $0xbf8] sm:$0xff] %v918_v63  ;;  %v924_v11 = vmax.f32 %v412_v8, 0.0  ;;  %v414_v13 = vld [vmem:[#allocation2 + $0xc38] sm:$0xff]  ;;  %v415_v14 = vld [vmem:[#allocation2 + $0xc40] sm:$0xff]  ;;  %1431 = vst [vmem:[#allocation5 + $0xc00] sm:$0xff] %v919_v3  ;;  %v925_v15 = vmax.f32 %v413_v12, 0.0 }
  0xd2   :  { %1432 = vst [vmem:[#allocation5 + $0xc08] sm:$0xff] %v920_v4  ;;  %1433 = vst [vmem:[#allocation5 + $0xc10] sm:$0xff] %v921_v5  ;;  %v926_v16 = vmax.f32 %v414_v13, 0.0  ;;  %v927_v17 = vmax.f32 %v415_v14, 0.0  ;;  %v416_v18 = vld [vmem:[#allocation2 + $0xc48] sm:$0xff]  ;;  %v417_v19 = vld [vmem:[#allocation2 + $0xc50] sm:$0xff] }
  0xd3   :  { %v418_v20 = vld [vmem:[#allocation2 + $0xc58] sm:$0xff]  ;;  %1434 = vst [vmem:[#allocation5 + $0xc18] sm:$0xff] %v922_v9  ;;  %1435 = vst [vmem:[#allocation5 + $0xc20] sm:$0xff] %v923_v10  ;;  %v928_v21 = vmax.f32 %v416_v18, 0.0  ;;  %v929_v22 = vmax.f32 %v417_v19, 0.0  ;;  %v419_v24 = vld [vmem:[#allocation2 + $0xc60] sm:$0xff] }
  0xd4   :  { %1436 = vst [vmem:[#allocation5 + $0xc28] sm:$0xff] %v924_v11  ;;  %v930_v23 = vmax.f32 %v418_v20, 0.0  ;;  %v420_v25 = vld [vmem:[#allocation2 + $0xc68] sm:$0xff]  ;;  %v421_v26 = vld [vmem:[#allocation2 + $0xc70] sm:$0xff]  ;;  %1437 = vst [vmem:[#allocation5 + $0xc30] sm:$0xff] %v925_v15  ;;  %v931_v27 = vmax.f32 %v419_v24, 0.0 }
  0xd5   :  { %1438 = vst [vmem:[#allocation5 + $0xc38] sm:$0xff] %v926_v16  ;;  %1439 = vst [vmem:[#allocation5 + $0xc40] sm:$0xff] %v927_v17  ;;  %v932_v28 = vmax.f32 %v420_v25, 0.0  ;;  %v933_v29 = vmax.f32 %v421_v26, 0.0  ;;  %v422_v30 = vld [vmem:[#allocation2 + $0xc78] sm:$0xff]  ;;  %v423_v31 = vld [vmem:[#allocation2 + $0xc80] sm:$0xff] }
  0xd6   :  { %v424_v32 = vld [vmem:[#allocation2 + $0xc88] sm:$0xff]  ;;  %1440 = vst [vmem:[#allocation5 + $0xc48] sm:$0xff] %v928_v21  ;;  %1441 = vst [vmem:[#allocation5 + $0xc50] sm:$0xff] %v929_v22  ;;  %v934_v33 = vmax.f32 %v422_v30, 0.0  ;;  %v935_v34 = vmax.f32 %v423_v31, 0.0  ;;  %v425_v36 = vld [vmem:[#allocation2 + $0xc90] sm:$0xff] }
  0xd7   :  { %1442 = vst [vmem:[#allocation5 + $0xc58] sm:$0xff] %v930_v23  ;;  %v936_v35 = vmax.f32 %v424_v32, 0.0  ;;  %v426_v37 = vld [vmem:[#allocation2 + $0xc98] sm:$0xff]  ;;  %v427_v38 = vld [vmem:[#allocation2 + $0xca0] sm:$0xff]  ;;  %1443 = vst [vmem:[#allocation5 + $0xc60] sm:$0xff] %v931_v27  ;;  %v937_v39 = vmax.f32 %v425_v36, 0.0 }
  0xd8   :  { %1444 = vst [vmem:[#allocation5 + $0xc68] sm:$0xff] %v932_v28  ;;  %1445 = vst [vmem:[#allocation5 + $0xc70] sm:$0xff] %v933_v29  ;;  %v938_v40 = vmax.f32 %v426_v37, 0.0  ;;  %v939_v41 = vmax.f32 %v427_v38, 0.0  ;;  %v428_v42 = vld [vmem:[#allocation2 + $0xca8] sm:$0xff]  ;;  %v429_v43 = vld [vmem:[#allocation2 + $0xcb0] sm:$0xff] }
  0xd9   :  { %v430_v44 = vld [vmem:[#allocation2 + $0xcb8] sm:$0xff]  ;;  %1446 = vst [vmem:[#allocation5 + $0xc78] sm:$0xff] %v934_v33  ;;  %1447 = vst [vmem:[#allocation5 + $0xc80] sm:$0xff] %v935_v34  ;;  %v940_v45 = vmax.f32 %v428_v42, 0.0  ;;  %v941_v46 = vmax.f32 %v429_v43, 0.0  ;;  %v431_v48 = vld [vmem:[#allocation2 + $0xcc0] sm:$0xff] }
  0xda   :  { %1448 = vst [vmem:[#allocation5 + $0xc88] sm:$0xff] %v936_v35  ;;  %v942_v47 = vmax.f32 %v430_v44, 0.0  ;;  %v432_v49 = vld [vmem:[#allocation2 + $0xcc8] sm:$0xff]  ;;  %v433_v50 = vld [vmem:[#allocation2 + $0xcd0] sm:$0xff]  ;;  %1449 = vst [vmem:[#allocation5 + $0xc90] sm:$0xff] %v937_v39  ;;  %v943_v51 = vmax.f32 %v431_v48, 0.0 }
  0xdb   :  { %1450 = vst [vmem:[#allocation5 + $0xc98] sm:$0xff] %v938_v40  ;;  %1451 = vst [vmem:[#allocation5 + $0xca0] sm:$0xff] %v939_v41  ;;  %v944_v52 = vmax.f32 %v432_v49, 0.0  ;;  %v945_v53 = vmax.f32 %v433_v50, 0.0  ;;  %v434_v54 = vld [vmem:[#allocation2 + $0xcd8] sm:$0xff]  ;;  %v435_v55 = vld [vmem:[#allocation2 + $0xce0] sm:$0xff] }
  0xdc   :  { %v436_v56 = vld [vmem:[#allocation2 + $0xce8] sm:$0xff]  ;;  %1452 = vst [vmem:[#allocation5 + $0xca8] sm:$0xff] %v940_v45  ;;  %1453 = vst [vmem:[#allocation5 + $0xcb0] sm:$0xff] %v941_v46  ;;  %v946_v57 = vmax.f32 %v434_v54, 0.0  ;;  %v947_v58 = vmax.f32 %v435_v55, 0.0  ;;  %v437_v60 = vld [vmem:[#allocation2 + $0xcf0] sm:$0xff] }
  0xdd   :  { %1454 = vst [vmem:[#allocation5 + $0xcb8] sm:$0xff] %v942_v47  ;;  %v948_v59 = vmax.f32 %v436_v56, 0.0  ;;  %v438_v61 = vld [vmem:[#allocation2 + $0xcf8] sm:$0xff]  ;;  %v439_v62 = vld [vmem:[#allocation2 + $0xd00] sm:$0xff]  ;;  %1455 = vst [vmem:[#allocation5 + $0xcc0] sm:$0xff] %v943_v51  ;;  %v949_v63 = vmax.f32 %v437_v60, 0.0 }
  0xde   :  { %1456 = vst [vmem:[#allocation5 + $0xcc8] sm:$0xff] %v944_v52  ;;  %1457 = vst [vmem:[#allocation5 + $0xcd0] sm:$0xff] %v945_v53  ;;  %v950_v0 = vmax.f32 %v438_v61, 0.0  ;;  %v951_v1 = vmax.f32 %v439_v62, 0.0  ;;  %v440_v2 = vld [vmem:[#allocation2 + $0xd08] sm:$0xff]  ;;  %v441_v3 = vld [vmem:[#allocation2 + $0xd10] sm:$0xff] }
  0xdf   :  { %v442_v4 = vld [vmem:[#allocation2 + $0xd18] sm:$0xff]  ;;  %1458 = vst [vmem:[#allocation5 + $0xcd8] sm:$0xff] %v946_v57  ;;  %1459 = vst [vmem:[#allocation5 + $0xce0] sm:$0xff] %v947_v58  ;;  %v952_v5 = vmax.f32 %v440_v2, 0.0  ;;  %v953_v6 = vmax.f32 %v441_v3, 0.0  ;;  %v443_v8 = vld [vmem:[#allocation2 + $0xd20] sm:$0xff] }
  0xe0   :  { %1460 = vst [vmem:[#allocation5 + $0xce8] sm:$0xff] %v948_v59  ;;  %v954_v7 = vmax.f32 %v442_v4, 0.0  ;;  %v444_v9 = vld [vmem:[#allocation2 + $0xd28] sm:$0xff]  ;;  %v445_v10 = vld [vmem:[#allocation2 + $0xd30] sm:$0xff]  ;;  %1461 = vst [vmem:[#allocation5 + $0xcf0] sm:$0xff] %v949_v63  ;;  %v955_v11 = vmax.f32 %v443_v8, 0.0 }
  0xe1   :  { %1462 = vst [vmem:[#allocation5 + $0xcf8] sm:$0xff] %v950_v0  ;;  %1463 = vst [vmem:[#allocation5 + $0xd00] sm:$0xff] %v951_v1  ;;  %v956_v12 = vmax.f32 %v444_v9, 0.0  ;;  %v957_v13 = vmax.f32 %v445_v10, 0.0  ;;  %v446_v14 = vld [vmem:[#allocation2 + $0xd38] sm:$0xff]  ;;  %v447_v15 = vld [vmem:[#allocation2 + $0xd40] sm:$0xff] }
  0xe2   :  { %v448_v16 = vld [vmem:[#allocation2 + $0xd48] sm:$0xff]  ;;  %1464 = vst [vmem:[#allocation5 + $0xd08] sm:$0xff] %v952_v5  ;;  %1465 = vst [vmem:[#allocation5 + $0xd10] sm:$0xff] %v953_v6  ;;  %v958_v17 = vmax.f32 %v446_v14, 0.0  ;;  %v959_v18 = vmax.f32 %v447_v15, 0.0  ;;  %v449_v20 = vld [vmem:[#allocation2 + $0xd50] sm:$0xff] }
  0xe3   :  { %1466 = vst [vmem:[#allocation5 + $0xd18] sm:$0xff] %v954_v7  ;;  %v960_v19 = vmax.f32 %v448_v16, 0.0  ;;  %v450_v21 = vld [vmem:[#allocation2 + $0xd58] sm:$0xff]  ;;  %v451_v22 = vld [vmem:[#allocation2 + $0xd60] sm:$0xff]  ;;  %1467 = vst [vmem:[#allocation5 + $0xd20] sm:$0xff] %v955_v11  ;;  %v961_v23 = vmax.f32 %v449_v20, 0.0 }
  0xe4   :  { %1468 = vst [vmem:[#allocation5 + $0xd28] sm:$0xff] %v956_v12  ;;  %1469 = vst [vmem:[#allocation5 + $0xd30] sm:$0xff] %v957_v13  ;;  %v962_v24 = vmax.f32 %v450_v21, 0.0  ;;  %v963_v25 = vmax.f32 %v451_v22, 0.0  ;;  %v452_v26 = vld [vmem:[#allocation2 + $0xd68] sm:$0xff]  ;;  %v453_v27 = vld [vmem:[#allocation2 + $0xd70] sm:$0xff] }
  0xe5   :  { %v454_v28 = vld [vmem:[#allocation2 + $0xd78] sm:$0xff]  ;;  %1470 = vst [vmem:[#allocation5 + $0xd38] sm:$0xff] %v958_v17  ;;  %1471 = vst [vmem:[#allocation5 + $0xd40] sm:$0xff] %v959_v18  ;;  %v964_v29 = vmax.f32 %v452_v26, 0.0  ;;  %v965_v30 = vmax.f32 %v453_v27, 0.0  ;;  %v455_v32 = vld [vmem:[#allocation2 + $0xd80] sm:$0xff] }
  0xe6   :  { %1472 = vst [vmem:[#allocation5 + $0xd48] sm:$0xff] %v960_v19  ;;  %v966_v31 = vmax.f32 %v454_v28, 0.0  ;;  %v456_v33 = vld [vmem:[#allocation2 + $0xd88] sm:$0xff]  ;;  %v457_v34 = vld [vmem:[#allocation2 + $0xd90] sm:$0xff]  ;;  %1473 = vst [vmem:[#allocation5 + $0xd50] sm:$0xff] %v961_v23  ;;  %v967_v35 = vmax.f32 %v455_v32, 0.0 }
  0xe7   :  { %1474 = vst [vmem:[#allocation5 + $0xd58] sm:$0xff] %v962_v24  ;;  %1475 = vst [vmem:[#allocation5 + $0xd60] sm:$0xff] %v963_v25  ;;  %v968_v36 = vmax.f32 %v456_v33, 0.0  ;;  %v969_v37 = vmax.f32 %v457_v34, 0.0  ;;  %v458_v38 = vld [vmem:[#allocation2 + $0xd98] sm:$0xff]  ;;  %v459_v39 = vld [vmem:[#allocation2 + $0xda0] sm:$0xff] }
  0xe8   :  { %v460_v40 = vld [vmem:[#allocation2 + $0xda8] sm:$0xff]  ;;  %1476 = vst [vmem:[#allocation5 + $0xd68] sm:$0xff] %v964_v29  ;;  %1477 = vst [vmem:[#allocation5 + $0xd70] sm:$0xff] %v965_v30  ;;  %v970_v41 = vmax.f32 %v458_v38, 0.0  ;;  %v971_v42 = vmax.f32 %v459_v39, 0.0  ;;  %v461_v44 = vld [vmem:[#allocation2 + $0xdb0] sm:$0xff] }
  0xe9   :  { %1478 = vst [vmem:[#allocation5 + $0xd78] sm:$0xff] %v966_v31  ;;  %v972_v43 = vmax.f32 %v460_v40, 0.0  ;;  %v462_v45 = vld [vmem:[#allocation2 + $0xdb8] sm:$0xff]  ;;  %v463_v46 = vld [vmem:[#allocation2 + $0xdc0] sm:$0xff]  ;;  %1479 = vst [vmem:[#allocation5 + $0xd80] sm:$0xff] %v967_v35  ;;  %v973_v47 = vmax.f32 %v461_v44, 0.0 }
  0xea   :  { %1480 = vst [vmem:[#allocation5 + $0xd88] sm:$0xff] %v968_v36  ;;  %1481 = vst [vmem:[#allocation5 + $0xd90] sm:$0xff] %v969_v37  ;;  %v974_v48 = vmax.f32 %v462_v45, 0.0  ;;  %v975_v49 = vmax.f32 %v463_v46, 0.0  ;;  %v464_v50 = vld [vmem:[#allocation2 + $0xdc8] sm:$0xff]  ;;  %v465_v51 = vld [vmem:[#allocation2 + $0xdd0] sm:$0xff] }
  0xeb   :  { %v466_v52 = vld [vmem:[#allocation2 + $0xdd8] sm:$0xff]  ;;  %1482 = vst [vmem:[#allocation5 + $0xd98] sm:$0xff] %v970_v41  ;;  %1483 = vst [vmem:[#allocation5 + $0xda0] sm:$0xff] %v971_v42  ;;  %v976_v53 = vmax.f32 %v464_v50, 0.0  ;;  %v977_v54 = vmax.f32 %v465_v51, 0.0  ;;  %v467_v56 = vld [vmem:[#allocation2 + $0xde0] sm:$0xff] }
  0xec   :  { %1484 = vst [vmem:[#allocation5 + $0xda8] sm:$0xff] %v972_v43  ;;  %v978_v55 = vmax.f32 %v466_v52, 0.0  ;;  %v468_v57 = vld [vmem:[#allocation2 + $0xde8] sm:$0xff]  ;;  %v469_v58 = vld [vmem:[#allocation2 + $0xdf0] sm:$0xff]  ;;  %1485 = vst [vmem:[#allocation5 + $0xdb0] sm:$0xff] %v973_v47  ;;  %v979_v59 = vmax.f32 %v467_v56, 0.0 }
  0xed   :  { %1486 = vst [vmem:[#allocation5 + $0xdb8] sm:$0xff] %v974_v48  ;;  %1487 = vst [vmem:[#allocation5 + $0xdc0] sm:$0xff] %v975_v49  ;;  %v980_v60 = vmax.f32 %v468_v57, 0.0  ;;  %v981_v61 = vmax.f32 %v469_v58, 0.0  ;;  %v470_v62 = vld [vmem:[#allocation2 + $0xdf8] sm:$0xff]  ;;  %v471_v63 = vld [vmem:[#allocation2 + $0xe00] sm:$0xff] }
  0xee   :  { %v472_v0 = vld [vmem:[#allocation2 + $0xe08] sm:$0xff]  ;;  %1488 = vst [vmem:[#allocation5 + $0xdc8] sm:$0xff] %v976_v53  ;;  %1489 = vst [vmem:[#allocation5 + $0xdd0] sm:$0xff] %v977_v54  ;;  %v982_v1 = vmax.f32 %v470_v62, 0.0  ;;  %v983_v2 = vmax.f32 %v471_v63, 0.0  ;;  %v473_v4 = vld [vmem:[#allocation2 + $0xe10] sm:$0xff] }
  0xef   :  { %1490 = vst [vmem:[#allocation5 + $0xdd8] sm:$0xff] %v978_v55  ;;  %v984_v3 = vmax.f32 %v472_v0, 0.0  ;;  %v474_v5 = vld [vmem:[#allocation2 + $0xe18] sm:$0xff]  ;;  %v475_v6 = vld [vmem:[#allocation2 + $0xe20] sm:$0xff]  ;;  %1491 = vst [vmem:[#allocation5 + $0xde0] sm:$0xff] %v979_v59  ;;  %v985_v7 = vmax.f32 %v473_v4, 0.0 }
  0xf0   :  { %1492 = vst [vmem:[#allocation5 + $0xde8] sm:$0xff] %v980_v60  ;;  %1493 = vst [vmem:[#allocation5 + $0xdf0] sm:$0xff] %v981_v61  ;;  %v986_v8 = vmax.f32 %v474_v5, 0.0  ;;  %v987_v9 = vmax.f32 %v475_v6, 0.0  ;;  %v476_v10 = vld [vmem:[#allocation2 + $0xe28] sm:$0xff]  ;;  %v477_v11 = vld [vmem:[#allocation2 + $0xe30] sm:$0xff] }
  0xf1   :  { %v478_v12 = vld [vmem:[#allocation2 + $0xe38] sm:$0xff]  ;;  %1494 = vst [vmem:[#allocation5 + $0xdf8] sm:$0xff] %v982_v1  ;;  %1495 = vst [vmem:[#allocation5 + $0xe00] sm:$0xff] %v983_v2  ;;  %v988_v13 = vmax.f32 %v476_v10, 0.0  ;;  %v989_v14 = vmax.f32 %v477_v11, 0.0  ;;  %v479_v16 = vld [vmem:[#allocation2 + $0xe40] sm:$0xff] }
  0xf2   :  { %1496 = vst [vmem:[#allocation5 + $0xe08] sm:$0xff] %v984_v3  ;;  %v990_v15 = vmax.f32 %v478_v12, 0.0  ;;  %v480_v17 = vld [vmem:[#allocation2 + $0xe48] sm:$0xff]  ;;  %v481_v18 = vld [vmem:[#allocation2 + $0xe50] sm:$0xff]  ;;  %1497 = vst [vmem:[#allocation5 + $0xe10] sm:$0xff] %v985_v7  ;;  %v991_v19 = vmax.f32 %v479_v16, 0.0 }
  0xf3   :  { %1498 = vst [vmem:[#allocation5 + $0xe18] sm:$0xff] %v986_v8  ;;  %1499 = vst [vmem:[#allocation5 + $0xe20] sm:$0xff] %v987_v9  ;;  %v992_v20 = vmax.f32 %v480_v17, 0.0  ;;  %v993_v21 = vmax.f32 %v481_v18, 0.0  ;;  %v482_v22 = vld [vmem:[#allocation2 + $0xe58] sm:$0xff]  ;;  %v483_v23 = vld [vmem:[#allocation2 + $0xe60] sm:$0xff] }
  0xf4   :  { %v484_v24 = vld [vmem:[#allocation2 + $0xe68] sm:$0xff]  ;;  %1500 = vst [vmem:[#allocation5 + $0xe28] sm:$0xff] %v988_v13  ;;  %1501 = vst [vmem:[#allocation5 + $0xe30] sm:$0xff] %v989_v14  ;;  %v994_v25 = vmax.f32 %v482_v22, 0.0  ;;  %v995_v26 = vmax.f32 %v483_v23, 0.0  ;;  %v485_v28 = vld [vmem:[#allocation2 + $0xe70] sm:$0xff] }
  0xf5   :  { %1502 = vst [vmem:[#allocation5 + $0xe38] sm:$0xff] %v990_v15  ;;  %v996_v27 = vmax.f32 %v484_v24, 0.0  ;;  %v486_v29 = vld [vmem:[#allocation2 + $0xe78] sm:$0xff]  ;;  %v487_v30 = vld [vmem:[#allocation2 + $0xe80] sm:$0xff]  ;;  %1503 = vst [vmem:[#allocation5 + $0xe40] sm:$0xff] %v991_v19  ;;  %v997_v31 = vmax.f32 %v485_v28, 0.0 }
  0xf6   :  { %1504 = vst [vmem:[#allocation5 + $0xe48] sm:$0xff] %v992_v20  ;;  %1505 = vst [vmem:[#allocation5 + $0xe50] sm:$0xff] %v993_v21  ;;  %v998_v32 = vmax.f32 %v486_v29, 0.0  ;;  %v999_v33 = vmax.f32 %v487_v30, 0.0  ;;  %v488_v34 = vld [vmem:[#allocation2 + $0xe88] sm:$0xff]  ;;  %v489_v35 = vld [vmem:[#allocation2 + $0xe90] sm:$0xff] }
  0xf7   :  { %v490_v36 = vld [vmem:[#allocation2 + $0xe98] sm:$0xff]  ;;  %1506 = vst [vmem:[#allocation5 + $0xe58] sm:$0xff] %v994_v25  ;;  %1507 = vst [vmem:[#allocation5 + $0xe60] sm:$0xff] %v995_v26  ;;  %v1000_v37 = vmax.f32 %v488_v34, 0.0  ;;  %v1001_v38 = vmax.f32 %v489_v35, 0.0  ;;  %v491_v40 = vld [vmem:[#allocation2 + $0xea0] sm:$0xff] }
  0xf8   :  { %1508 = vst [vmem:[#allocation5 + $0xe68] sm:$0xff] %v996_v27  ;;  %v1002_v39 = vmax.f32 %v490_v36, 0.0  ;;  %v492_v41 = vld [vmem:[#allocation2 + $0xea8] sm:$0xff]  ;;  %v493_v42 = vld [vmem:[#allocation2 + $0xeb0] sm:$0xff]  ;;  %1509 = vst [vmem:[#allocation5 + $0xe70] sm:$0xff] %v997_v31  ;;  %v1003_v43 = vmax.f32 %v491_v40, 0.0 }
  0xf9   :  { %1510 = vst [vmem:[#allocation5 + $0xe78] sm:$0xff] %v998_v32  ;;  %1511 = vst [vmem:[#allocation5 + $0xe80] sm:$0xff] %v999_v33  ;;  %v1004_v44 = vmax.f32 %v492_v41, 0.0  ;;  %v1005_v45 = vmax.f32 %v493_v42, 0.0  ;;  %v494_v46 = vld [vmem:[#allocation2 + $0xeb8] sm:$0xff]  ;;  %v495_v47 = vld [vmem:[#allocation2 + $0xec0] sm:$0xff] }
  0xfa   :  { %v496_v48 = vld [vmem:[#allocation2 + $0xec8] sm:$0xff]  ;;  %1512 = vst [vmem:[#allocation5 + $0xe88] sm:$0xff] %v1000_v37  ;;  %1513 = vst [vmem:[#allocation5 + $0xe90] sm:$0xff] %v1001_v38  ;;  %v1006_v49 = vmax.f32 %v494_v46, 0.0  ;;  %v1007_v50 = vmax.f32 %v495_v47, 0.0  ;;  %v497_v52 = vld [vmem:[#allocation2 + $0xed0] sm:$0xff] }
  0xfb   :  { %1514 = vst [vmem:[#allocation5 + $0xe98] sm:$0xff] %v1002_v39  ;;  %v1008_v51 = vmax.f32 %v496_v48, 0.0  ;;  %v498_v53 = vld [vmem:[#allocation2 + $0xed8] sm:$0xff]  ;;  %v499_v54 = vld [vmem:[#allocation2 + $0xee0] sm:$0xff]  ;;  %1515 = vst [vmem:[#allocation5 + $0xea0] sm:$0xff] %v1003_v43  ;;  %v1009_v55 = vmax.f32 %v497_v52, 0.0 }
  0xfc   :  { %1516 = vst [vmem:[#allocation5 + $0xea8] sm:$0xff] %v1004_v44  ;;  %1517 = vst [vmem:[#allocation5 + $0xeb0] sm:$0xff] %v1005_v45  ;;  %v1010_v56 = vmax.f32 %v498_v53, 0.0  ;;  %v1011_v57 = vmax.f32 %v499_v54, 0.0  ;;  %v500_v58 = vld [vmem:[#allocation2 + $0xee8] sm:$0xff]  ;;  %v501_v59 = vld [vmem:[#allocation2 + $0xef0] sm:$0xff] }
  0xfd   :  { %v502_v60 = vld [vmem:[#allocation2 + $0xef8] sm:$0xff]  ;;  %1518 = vst [vmem:[#allocation5 + $0xeb8] sm:$0xff] %v1006_v49  ;;  %1519 = vst [vmem:[#allocation5 + $0xec0] sm:$0xff] %v1007_v50  ;;  %v1012_v61 = vmax.f32 %v500_v58, 0.0  ;;  %v1013_v62 = vmax.f32 %v501_v59, 0.0  ;;  %v503_v0 = vld [vmem:[#allocation2 + $0xf00] sm:$0xff] }
  0xfe   :  { %1520 = vst [vmem:[#allocation5 + $0xec8] sm:$0xff] %v1008_v51  ;;  %v1014_v63 = vmax.f32 %v502_v60, 0.0  ;;  %v504_v1 = vld [vmem:[#allocation2 + $0xf08] sm:$0xff]  ;;  %v505_v2 = vld [vmem:[#allocation2 + $0xf10] sm:$0xff]  ;;  %1521 = vst [vmem:[#allocation5 + $0xed0] sm:$0xff] %v1009_v55  ;;  %v1015_v3 = vmax.f32 %v503_v0, 0.0 }
  0xff   :  { %1522 = vst [vmem:[#allocation5 + $0xed8] sm:$0xff] %v1010_v56  ;;  %1523 = vst [vmem:[#allocation5 + $0xee0] sm:$0xff] %v1011_v57  ;;  %v1016_v4 = vmax.f32 %v504_v1, 0.0  ;;  %v1017_v5 = vmax.f32 %v505_v2, 0.0  ;;  %v506_v6 = vld [vmem:[#allocation2 + $0xf18] sm:$0xff]  ;;  %v507_v7 = vld [vmem:[#allocation2 + $0xf20] sm:$0xff] }
 0x100   :  { %v508_v8 = vld [vmem:[#allocation2 + $0xf28] sm:$0xff]  ;;  %1524 = vst [vmem:[#allocation5 + $0xee8] sm:$0xff] %v1012_v61  ;;  %1525 = vst [vmem:[#allocation5 + $0xef0] sm:$0xff] %v1013_v62  ;;  %v1018_v9 = vmax.f32 %v506_v6, 0.0  ;;  %v1019_v10 = vmax.f32 %v507_v7, 0.0  ;;  %v509_v12 = vld [vmem:[#allocation2 + $0xf30] sm:$0xff] }
 0x101   :  { %1526 = vst [vmem:[#allocation5 + $0xef8] sm:$0xff] %v1014_v63  ;;  %v1020_v11 = vmax.f32 %v508_v8, 0.0  ;;  %v510_v13 = vld [vmem:[#allocation2 + $0xf38] sm:$0xff]  ;;  %v511_v14 = vld [vmem:[#allocation2 + $0xf40] sm:$0xff]  ;;  %1527 = vst [vmem:[#allocation5 + $0xf00] sm:$0xff] %v1015_v3  ;;  %v1021_v15 = vmax.f32 %v509_v12, 0.0 }
 0x102   :  { %1528 = vst [vmem:[#allocation5 + $0xf08] sm:$0xff] %v1016_v4  ;;  %1529 = vst [vmem:[#allocation5 + $0xf10] sm:$0xff] %v1017_v5  ;;  %v1022_v16 = vmax.f32 %v510_v13, 0.0  ;;  %v1023_v17 = vmax.f32 %v511_v14, 0.0  ;;  %v512_v18 = vld [vmem:[#allocation2 + $0xf48] sm:$0xff]  ;;  %v513_v19 = vld [vmem:[#allocation2 + $0xf50] sm:$0xff] }
 0x103   :  { %v514_v20 = vld [vmem:[#allocation2 + $0xf58] sm:$0xff]  ;;  %1530 = vst [vmem:[#allocation5 + $0xf18] sm:$0xff] %v1018_v9  ;;  %1531 = vst [vmem:[#allocation5 + $0xf20] sm:$0xff] %v1019_v10  ;;  %v1024_v21 = vmax.f32 %v512_v18, 0.0  ;;  %v1025_v22 = vmax.f32 %v513_v19, 0.0  ;;  %v515_v24 = vld [vmem:[#allocation2 + $0xf60] sm:$0xff] }
 0x104   :  { %1532 = vst [vmem:[#allocation5 + $0xf28] sm:$0xff] %v1020_v11  ;;  %v1026_v23 = vmax.f32 %v514_v20, 0.0  ;;  %v516_v25 = vld [vmem:[#allocation2 + $0xf68] sm:$0xff]  ;;  %v517_v26 = vld [vmem:[#allocation2 + $0xf70] sm:$0xff]  ;;  %1533 = vst [vmem:[#allocation5 + $0xf30] sm:$0xff] %v1021_v15  ;;  %v1027_v27 = vmax.f32 %v515_v24, 0.0 }
 0x105   :  { %1534 = vst [vmem:[#allocation5 + $0xf38] sm:$0xff] %v1022_v16  ;;  %1535 = vst [vmem:[#allocation5 + $0xf40] sm:$0xff] %v1023_v17  ;;  %v1028_v28 = vmax.f32 %v516_v25, 0.0  ;;  %v1029_v29 = vmax.f32 %v517_v26, 0.0  ;;  %v518_v30 = vld [vmem:[#allocation2 + $0xf78] sm:$0xff]  ;;  %v519_v31 = vld [vmem:[#allocation2 + $0xf80] sm:$0xff] }
 0x106   :  { %v520_v32 = vld [vmem:[#allocation2 + $0xf88] sm:$0xff]  ;;  %1536 = vst [vmem:[#allocation5 + $0xf48] sm:$0xff] %v1024_v21  ;;  %1537 = vst [vmem:[#allocation5 + $0xf50] sm:$0xff] %v1025_v22  ;;  %v1030_v33 = vmax.f32 %v518_v30, 0.0  ;;  %v1031_v34 = vmax.f32 %v519_v31, 0.0  ;;  %v521_v36 = vld [vmem:[#allocation2 + $0xf90] sm:$0xff] }
 0x107   :  { %1538 = vst [vmem:[#allocation5 + $0xf58] sm:$0xff] %v1026_v23  ;;  %v1032_v35 = vmax.f32 %v520_v32, 0.0  ;;  %v522_v37 = vld [vmem:[#allocation2 + $0xf98] sm:$0xff]  ;;  %v523_v38 = vld [vmem:[#allocation2 + $0xfa0] sm:$0xff]  ;;  %1539 = vst [vmem:[#allocation5 + $0xf60] sm:$0xff] %v1027_v27  ;;  %v1033_v39 = vmax.f32 %v521_v36, 0.0 }
 0x108   :  { %1540 = vst [vmem:[#allocation5 + $0xf68] sm:$0xff] %v1028_v28  ;;  %1541 = vst [vmem:[#allocation5 + $0xf70] sm:$0xff] %v1029_v29  ;;  %v1034_v40 = vmax.f32 %v522_v37, 0.0  ;;  %v1035_v41 = vmax.f32 %v523_v38, 0.0  ;;  %v524_v42 = vld [vmem:[#allocation2 + $0xfa8] sm:$0xff]  ;;  %v525_v43 = vld [vmem:[#allocation2 + $0xfb0] sm:$0xff] }
 0x109   :  { %v526_v44 = vld [vmem:[#allocation2 + $0xfb8] sm:$0xff]  ;;  %1542 = vst [vmem:[#allocation5 + $0xf78] sm:$0xff] %v1030_v33  ;;  %1543 = vst [vmem:[#allocation5 + $0xf80] sm:$0xff] %v1031_v34  ;;  %v1036_v45 = vmax.f32 %v524_v42, 0.0  ;;  %v1037_v46 = vmax.f32 %v525_v43, 0.0  ;;  %v527_v48 = vld [vmem:[#allocation2 + $0xfc0] sm:$0xff] }
 0x10a   :  { %1544 = vst [vmem:[#allocation5 + $0xf88] sm:$0xff] %v1032_v35  ;;  %v1038_v47 = vmax.f32 %v526_v44, 0.0  ;;  %v528_v49 = vld [vmem:[#allocation2 + $0xfc8] sm:$0xff]  ;;  %v529_v50 = vld [vmem:[#allocation2 + $0xfd0] sm:$0xff]  ;;  %1545 = vst [vmem:[#allocation5 + $0xf90] sm:$0xff] %v1033_v39  ;;  %v1039_v51 = vmax.f32 %v527_v48, 0.0 }
 0x10b   :  { %1546 = vst [vmem:[#allocation5 + $0xf98] sm:$0xff] %v1034_v40  ;;  %1547 = vst [vmem:[#allocation5 + $0xfa0] sm:$0xff] %v1035_v41  ;;  %v1040_v52 = vmax.f32 %v528_v49, 0.0  ;;  %v1041_v53 = vmax.f32 %v529_v50, 0.0  ;;  %v530_v54 = vld [vmem:[#allocation2 + $0xfd8] sm:$0xff]  ;;  %v531_v55 = vld [vmem:[#allocation2 + $0xfe0] sm:$0xff] }
 0x10c   :  { %v532_v56 = vld [vmem:[#allocation2 + $0xfe8] sm:$0xff]  ;;  %1548 = vst [vmem:[#allocation5 + $0xfa8] sm:$0xff] %v1036_v45  ;;  %1549 = vst [vmem:[#allocation5 + $0xfb0] sm:$0xff] %v1037_v46  ;;  %v1042_v57 = vmax.f32 %v530_v54, 0.0  ;;  %v1043_v58 = vmax.f32 %v531_v55, 0.0  ;;  %v533_v60 = vld [vmem:[#allocation2 + $0xff0] sm:$0xff] }
 0x10d   :  { %1550 = vst [vmem:[#allocation5 + $0xfb8] sm:$0xff] %v1038_v47  ;;  %v1044_v59 = vmax.f32 %v532_v56, 0.0  ;;  %v534_v61 = vld [vmem:[#allocation2 + $0xff8] sm:$0xff]  ;;  %1551 = vst [vmem:[#allocation5 + $0xfc0] sm:$0xff] %v1039_v51  ;;  %v1045_v62 = vmax.f32 %v533_v60, 0.0 }
 0x10e   :  { %1552 = vst [vmem:[#allocation5 + $0xfc8] sm:$0xff] %v1040_v52  ;;  %1553 = vst [vmem:[#allocation5 + $0xfd0] sm:$0xff] %v1041_v53  ;;  %v1046_v63 = vmax.f32 %v534_v61, 0.0 }
 0x10f   :  { %1554 = vst [vmem:[#allocation5 + $0xfd8] sm:$0xff] %v1042_v57  ;;  %1555 = vst [vmem:[#allocation5 + $0xfe0] sm:$0xff] %v1043_v58 }
 0x110   :  { %1556 = vst [vmem:[#allocation5 + $0xfe8] sm:$0xff] %v1044_v59  ;;  %1557 = vst [vmem:[#allocation5 + $0xff0] sm:$0xff] %v1045_v62 }
 0x111   :  { %1558 = vst [vmem:[#allocation5 + $0xff8] sm:$0xff] %v1046_v63 }
 0x112   :  { %1611 = shalt.err (!%p1608_p9)
}
 0x113   :  { %1570 = dma.vmem_to_hbm [thread:$0]  %s1565_s13, 65536, %s1651_s1, [#allocation4], %s1625_s9, %s1625_s9, %s1626_s10  }
 0x114   :  { %1622 = dma.done.wait [#allocation4], 65536  }
 0x115   :  { %1623 = vsyncadd [#allocation4], 4294901760 }
 0x116   :  { %1574 = vsyncpa [#allocation3], 1 }
 0x117   :  { %1575 = vsyncpa [#allocation4], 1 }

</bundles_post_ra>
